<compile_context>
chip_gen: v5e
topology: v5e:2x2
jax: 0.10.0
libtpu: 0.0.40
codegen_flags: <defaults>
</compile_context>

<pallas_src>
import jax
import jax.numpy as jnp
from jax.experimental import pallas as pl
from jax.experimental.pallas import tpu as pltpu

F_IN = 43      # raw input feature width (as in the PyTorch module)
F_PAD = 128    # zero-padded feature width (full lane tile)
HID = 256
SUBLANE = 16   # bf16 sublane tile (node-count padding granularity)


# ----------------------------------------------------------------------------
# Kernel
# ----------------------------------------------------------------------------
def gcn_kernel(x_ref, adj_ref,
               w0_ref, b0_ref, w1_ref, b1_ref, w2_ref, b2_ref,
               wf_ref, bf_ref,
               o_ref):
    TB, N, F = x_ref.shape          # (batch block, padded nodes, padded feats)
    H = o_ref.shape[-1]
    M = TB * N
    block_diag = (len(adj_ref.shape) == 2)   # (M, M) block-diag vs (TB, N, N)

    h = x_ref[...].reshape(M, F)             # bf16, free relayout (N % 16 == 0)

    if block_diag:
        adj_bd = adj_ref[...]                # (M, M) bf16

        def mix(z_bf16):
            # One MXU-filling matmul per layer instead of TB tiny (N,N) ones.
            return jnp.dot(adj_bd, z_bf16, preferred_element_type=jnp.float32)
    else:
        adj = adj_ref[...]                   # (TB, N, N) bf16 (large-N fallback)

        def mix(z_bf16):
            z3 = z_bf16.reshape(TB, N, -1)
            a = jnp.einsum('bij,bjd->bid', adj, z3,
                           preferred_element_type=jnp.float32)
            return a.reshape(M, -1)

    def layer(h_bf16, w_ref, b_ref):
        # Linear on the flattened slab (M rows feed the MXU), bias in f32,
        # then immediately drop to bf16 so only one f32 slab is live.
        z = jnp.dot(h_bf16, w_ref[...], preferred_element_type=jnp.float32)
        z = (z + b_ref[...]).astype(jnp.bfloat16)
        a = mix(z)                                        # f32 accumulation
        return jnp.maximum(a, 0.0).astype(jnp.bfloat16)   # fused ReLU + downcast

    h = layer(h, w0_ref, b0_ref)
    h = layer(h, w1_ref, b1_ref)
    h = layer(h, w2_ref, b2_ref)

    out = jnp.dot(h, wf_ref[...], preferred_element_type=jnp.float32) + bf_ref[...]
    o_ref[...] = out.reshape(TB, N, H).astype(o_ref.dtype)   # bf16 writeback


# ----------------------------------------------------------------------------
# Generation-aware tuning knobs
# ----------------------------------------------------------------------------
def _tpu_config():
    kind = ""
    try:
        kind = jax.devices()[0].device_kind.lower()
    except Exception:
        pass

    vmem_cap = None
    try:
        vmem_cap = int(pltpu.get_tpu_info().vmem_capacity_bytes)
    except Exception:
        vmem_cap = None

    v5e = ("v5e" in kind) or ("v5 lite" in kind) or ("v5lite" in kind)
    v6 = "v6" in kind
    v7 = ("v7" in kind) or ("tpu7" in kind)

    if v5e:
        # 4x128^2 MXU, 1 TC, 128 MiB VMEM -> M=128 fills the MXU, big blocks ok.
        cfg = dict(target_m=128, num_cores=1,
                   vmem_limit_bytes=64 << 20, vmem_budget_bytes=24 << 20,
                   assumed_cap=128 << 20)
    elif v6:
        # 2x256^2 MXU, 1 TC, 128 MiB VMEM -> target M=256.
        cfg = dict(target_m=256, num_cores=1,
                   vmem_limit_bytes=64 << 20, vmem_budget_bytes=24 << 20,
                   assumed_cap=128 << 20)
    elif v7:
        # 2x256^2 MXU, 2 TCs, 64 MiB VMEM -> M=256 per core, grid >= 2.
        cfg = dict(target_m=256, num_cores=2,
                   vmem_limit_bytes=32 << 20, vmem_budget_bytes=16 << 20,
                   assumed_cap=64 << 20)
    else:
        # Unknown generation: conservative (v7x-like) settings.
        cfg = dict(target_m=256, num_cores=2,
                   vmem_limit_bytes=32 << 20, vmem_budget_bytes=16 << 20,
                   assumed_cap=64 << 20)

    if vmem_cap is not None and vmem_cap < cfg["assumed_cap"]:
        cfg["vmem_limit_bytes"] = min(cfg["vmem_limit_bytes"], vmem_cap // 2)
        cfg["vmem_budget_bytes"] = min(cfg["vmem_budget_bytes"], vmem_cap // 4)
    return cfg


def _pick_block_b(B, N, cfg):
    """Batch block so the flattened M fills the MXU, fits the per-step VMEM
    working set (double-buffered streams + weights + f32 temporaries), and
    keeps every TensorCore busy."""
    def working_set_bytes(tb):
        m = tb * N
        bd = m <= 512
        adj_bytes = (m * m if bd else tb * N * N) * 2      # bf16 adjacency block
        x_bytes = tb * N * F_PAD * 2                       # bf16 input block
        out_bytes = tb * N * HID * 2                       # bf16 output block
        stream = 2 * (adj_bytes + x_bytes + out_bytes)     # double-buffered DMA
        weights = 2 * 2 * ((F_PAD + 3 * HID) * HID + 4 * HID)   # bf16, 2 buffers
        temps = 3 * m * HID * 4                            # live f32 slabs + slack
        return stream + weights + temps

    tb = max(1, min(B, pl.cdiv(cfg["target_m"], N)))
    while tb > 1 and working_set_bytes(tb) > cfg["vmem_budget_bytes"]:
        tb -= 1
    # Keep grid length >= number of TensorCores when the batch allows it
    # (grid=1 on a 2-TC v7x part would idle one core).
    min_grid = min(B, max(1, cfg["num_cores"]))
    tb = min(tb, max(1, pl.cdiv(B, min_grid)))
    return tb


# ----------------------------------------------------------------------------
# Wrapper
# ----------------------------------------------------------------------------
def net_comp_gcn_forward(x, adj, params, *, block_b=None, out_dtype=jnp.float32):
    """x: (B, N, 43) f32, adj: (B, N, N) f32 -> (B, N, 256) out_dtype."""
    B, N0, F = x.shape
    assert F == F_IN and adj.shape == (B, N0, N0)
    (w0, b0), (w1, b1), (w2, b2), (wf, bf) = params

    cfg = _tpu_config()

    # Pad nodes to a multiple of the bf16 sublane tile so in-kernel flattens
    # (TB, N, F) <-> (TB*N, F) are free relayouts.  Padded adjacency rows/cols
    # are zero, so padded nodes never contaminate real ones.
    N = pl.cdiv(N0, SUBLANE) * SUBLANE
    if N != N0:
        x = jnp.pad(x, ((0, 0), (0, N - N0), (0, 0)))
        adj = jnp.pad(adj, ((0, 0), (0, N - N0), (0, N - N0)))

    if block_b is None:
        block_b = _pick_block_b(B, N, cfg)
    block_b = max(1, min(block_b, B))
    Bp = pl.cdiv(B, block_b) * block_b
    if Bp != B:
        x = jnp.pad(x, ((0, Bp - B), (0, 0), (0, 0)))
        adj = jnp.pad(adj, ((0, Bp - B), (0, 0), (0, 0)))

    # Zero-pad the 43-wide features to a full 128-lane tile (and w0's rows).
    x = jnp.pad(x, ((0, 0), (0, 0), (0, F_PAD - F_IN)))
    w0 = jnp.pad(w0, ((0, F_PAD - F_IN), (0, 0)))

    # MXU operands in bf16 (halves DMA bytes); biases / accumulation stay f32.
    x = x.astype(jnp.bfloat16)
    adj = adj.astype(jnp.bfloat16)
    w0, w1, w2, wf = (w.astype(jnp.bfloat16) for w in (w0, w1, w2, wf))

    grid_len = Bp // block_b
    M = block_b * N
    use_block_diag = M <= 512   # one big matmul per layer while it stays small

    if use_block_diag:
        # Assemble one (M, M) block-diagonal adjacency per grid step so each
        # layer's adjacency mix is a single MXU-filling matmul instead of
        # block_b tiny (N, N) matmuls.
        eye = jnp.eye(block_b, dtype=jnp.bfloat16)
        adj_in = jnp.einsum('gbij,bc->gbicj',
                            adj.reshape(grid_len, block_b, N, N), eye
                            ).reshape(grid_len, M, M)
        adj_spec = pl.BlockSpec((None, M, M), lambda b: (b, 0, 0))
    else:
        # TODO(synk): for very large graphs (N >~ 700-800 on v7x's 64 MiB VMEM)
        # tile the adjacency over a node (K) grid axis with a pl.when-init
        # accumulator instead of loading the whole (block_b, N, N) block.
        adj_in = adj
        adj_spec = pl.BlockSpec((block_b, N, N), lambda b: (b, 0, 0))

    weight_spec = lambda shape: pl.BlockSpec(shape, lambda b: (0, 0))

    out = pl.pallas_call(
        gcn_kernel,
        out_shape=jax.ShapeDtypeStruct((Bp, N, HID), jnp.bfloat16),
        grid_spec=pltpu.PrefetchScalarGridSpec(
            num_scalar_prefetch=0,
            grid=(grid_len,),
            in_specs=[
                pl.BlockSpec((block_b, N, F_PAD), lambda b: (b, 0, 0)),  # x
                adj_spec,                                                # adj
                weight_spec((F_PAD, HID)), weight_spec((1, HID)),        # layer 0
                weight_spec((HID, HID)),   weight_spec((1, HID)),        # layer 1
                weight_spec((HID, HID)),   weight_spec((1, HID)),        # layer 2
                weight_spec((HID, HID)),   weight_spec((1, HID)),        # final
            ],
            out_specs=pl.BlockSpec((block_b, N, HID), lambda b: (b, 0, 0)),
        ),
        compiler_params=pltpu.CompilerParams(
            dimension_semantics=("parallel",),
            vmem_limit_bytes=cfg["vmem_limit_bytes"]),
    )(x, adj_in, w0, b0, w1, b1, w2, b2, wf, bf)

    # Slice off batch/node padding and cast once at the end.
    return out[:B, :N0].astype(out_dtype)


# ----------------------------------------------------------------------------
# Params / reference
# ----------------------------------------------------------------------------
def init_params(key):
    """Deterministic parameter init. Weights stored as (in, out); bias (1, out)."""
    def linear(key, fan_in, fan_out):
        kw, kb = jax.random.split(key)
        bound = 1.0 / jnp.sqrt(fan_in)
        w = jax.random.uniform(kw, (fan_in, fan_out), jnp.float32, -bound, bound)
        b = jax.random.uniform(kb, (1, fan_out), jnp.float32, -bound, bound)
        return w, b

    k0, k1, k2, kf = jax.random.split(key, 4)
    return (linear(k0, F_IN, HID),
            linear(k1, HID, HID),
            linear(k2, HID, HID),
            linear(kf, HID, HID))


def reference_forward(x, adj, params, compute_dtype=jnp.float32):
    """Pure-JAX reference of the PyTorch forward. `compute_dtype` controls the
    dtype fed to each matmul (accumulation is always f32)."""
    (w0, b0), (w1, b1), (w2, b2), (wf, bf) = params
    cd = compute_dtype
    h = x
    for (w, b) in ((w0, b0), (w1, b1), (w2, b2)):
        h = jnp.einsum('bnf,fo->bno', h.astype(cd), w.astype(cd),
                       preferred_element_type=jnp.float32) + b
        h = jnp.einsum('bij,bjd->bid', adj.astype(cd), h.astype(cd),
                       preferred_element_type=jnp.float32)
        h = jnp.maximum(h, 0.0)
    return jnp.einsum('bnf,fo->bno', h.astype(cd), wf.astype(cd),
                      preferred_element_type=jnp.float32) + bf


if __name__ == "__main__":
    key = jax.random.PRNGKey(0)
    kx, kadj, kp, kx2, kadj2 = jax.random.split(key, 5)

    # Small but MXU-friendly demo: 16 graphs of 16 nodes.  On v6e this becomes
    # one grid step with M=256 (full 256-wide MXU pass per layer); on v7x two
    # steps of M=128 so both TensorCores work; on v5e two steps of M=128.
    B, N = 16, 16
    x = jax.random.normal(kx, (B, N, F_IN), jnp.float32)
    adj = jax.random.uniform(kadj, (B, N, N), jnp.float32)
    params = init_params(kp)

    out = jax.block_until_ready(net_comp_gcn_forward(x, adj, params))
    assert out.shape == (B, N, HID)

    # Precision-matched check (bf16 MXU inputs, f32 accumulation, bf16 output).
    ref_bf16 = reference_forward(x, adj, params, jnp.bfloat16)
    assert jnp.allclose(out, ref_bf16, atol=1e-1, rtol=3e-2), \
        float(jnp.max(jnp.abs(out - ref_bf16)))

    # Relaxed sanity check against pure-f32 module semantics (deviation is only
    # due to the deliberate bf16 matmul-input / output choice).
    ref_f32 = reference_forward(x, adj, params, jnp.float32)
    rel = float(jnp.linalg.norm(out - ref_f32) / jnp.linalg.norm(ref_f32))
    assert rel < 0.1, rel

    # Exercise the batch-padding AND node-padding paths (B not a multiple of
    # the batch block, N not a multiple of the sublane tile).
    B2, N2 = 10, 12
    x2 = jax.random.normal(kx2, (B2, N2, F_IN), jnp.float32)
    adj2 = jax.random.uniform(kadj2, (B2, N2, N2), jnp.float32)
    out2 = jax.block_until_ready(net_comp_gcn_forward(x2, adj2, params))
    assert out2.shape == (B2, N2, HID)
    ref2 = reference_forward(x2, adj2, params, jnp.bfloat16)
    assert jnp.allclose(out2, ref2, atol=1e-1, rtol=3e-2), \
        float(jnp.max(jnp.abs(out2 - ref2)))

    print("KERNEL_OK")
</pallas_src>

<mosaic_0001>
module attributes {stable_mosaic.version = 11 : i64} {
  func.func @gcn_kernel(%arg0: i32, %arg1: memref<8x16x128xbf16, #tpu.memory_space<vmem>>, %arg2: memref<1x128x128xbf16, #tpu.memory_space<vmem>>, %arg3: memref<128x256xbf16, #tpu.memory_space<vmem>>, %arg4: memref<1x256xf32, #tpu.memory_space<vmem>>, %arg5: memref<256x256xbf16, #tpu.memory_space<vmem>>, %arg6: memref<1x256xf32, #tpu.memory_space<vmem>>, %arg7: memref<256x256xbf16, #tpu.memory_space<vmem>>, %arg8: memref<1x256xf32, #tpu.memory_space<vmem>>, %arg9: memref<256x256xbf16, #tpu.memory_space<vmem>>, %arg10: memref<1x256xf32, #tpu.memory_space<vmem>>, %arg11: memref<8x16x256xbf16, #tpu.memory_space<vmem>>) attributes {dimension_semantics = [#tpu.dimension_semantics<parallel>], iteration_bounds = array<i64: 2>, scalar_prefetch = 0 : i64, scratch_operands = 0 : i64, tpu.core_type = #tpu.core_type<tc>, window_params = [{transform_indices = @transform_0, window_bounds = array<i64: 8, 16, 128>}, {transform_indices = @transform_1, window_bounds = array<i64: 1, 128, 128>}, {pipeline_mode = #tpu.pipeline_mode<synchronous>, transform_indices = @transform_2, window_bounds = array<i64: 128, 256>}, {pipeline_mode = #tpu.pipeline_mode<synchronous>, transform_indices = @transform_3, window_bounds = array<i64: 1, 256>}, {pipeline_mode = #tpu.pipeline_mode<synchronous>, transform_indices = @transform_4, window_bounds = array<i64: 256, 256>}, {pipeline_mode = #tpu.pipeline_mode<synchronous>, transform_indices = @transform_5, window_bounds = array<i64: 1, 256>}, {pipeline_mode = #tpu.pipeline_mode<synchronous>, transform_indices = @transform_6, window_bounds = array<i64: 256, 256>}, {pipeline_mode = #tpu.pipeline_mode<synchronous>, transform_indices = @transform_7, window_bounds = array<i64: 1, 256>}, {pipeline_mode = #tpu.pipeline_mode<synchronous>, transform_indices = @transform_8, window_bounds = array<i64: 256, 256>}, {pipeline_mode = #tpu.pipeline_mode<synchronous>, transform_indices = @transform_9, window_bounds = array<i64: 1, 256>}, {transform_indices = @transform_10, window_bounds = array<i64: 8, 16, 256>}]} {
    %c0 = arith.constant 0 : index
    %c0_0 = arith.constant 0 : index
    %c0_1 = arith.constant 0 : index
    %0 = vector.load %arg1[%c0, %c0_0, %c0_1] : memref<8x16x128xbf16, #tpu.memory_space<vmem>>, vector<8x16x128xbf16>
    %1 = vector.shape_cast %0 : vector<8x16x128xbf16> to vector<128x128xbf16>
    %c0_2 = arith.constant 0 : index
    %c0_3 = arith.constant 0 : index
    %c0_4 = arith.constant 0 : index
    %2 = vector.load %arg2[%c0_2, %c0_3, %c0_4] : memref<1x128x128xbf16, #tpu.memory_space<vmem>>, vector<1x128x128xbf16>
    %3 = vector.shape_cast %2 : vector<1x128x128xbf16> to vector<128x128xbf16>
    %c0_5 = arith.constant 0 : index
    %c0_6 = arith.constant 0 : index
    %4 = vector.load %arg3[%c0_5, %c0_6] : memref<128x256xbf16, #tpu.memory_space<vmem>>, vector<128x256xbf16>
    %cst = arith.constant dense<0.000000e+00> : vector<128x256xf32>
    %5 = tpu.matmul %1, %4, %cst {dimension_numbers = #tpu.dot_dimension_numbers<[1], [0], [0], [1], [0, 0, 1, 1], [], []>} : vector<128x128xbf16>, vector<128x256xbf16>, vector<128x256xf32> -> vector<128x256xf32>
    %c0_7 = arith.constant 0 : index
    %c0_8 = arith.constant 0 : index
    %6 = vector.load %arg4[%c0_7, %c0_8] : memref<1x256xf32, #tpu.memory_space<vmem>>, vector<1x256xf32>
    %7 = vector.broadcast %6 : vector<1x256xf32> to vector<128x256xf32>
    %8 = arith.addf %5, %7 : vector<128x256xf32>
    %9 = arith.truncf %8 : vector<128x256xf32> to vector<128x256xbf16>
    %cst_9 = arith.constant dense<0.000000e+00> : vector<128x256xf32>
    %10 = tpu.matmul %3, %9, %cst_9 {dimension_numbers = #tpu.dot_dimension_numbers<[1], [0], [0], [1], [0, 0, 1, 1], [], []>} : vector<128x128xbf16>, vector<128x256xbf16>, vector<128x256xf32> -> vector<128x256xf32>
    %cst_10 = arith.constant 0.000000e+00 : f32
    %11 = vector.broadcast %cst_10 : f32 to vector<128x256xf32>
    %12 = arith.maximumf %10, %11 : vector<128x256xf32>
    %13 = arith.truncf %12 : vector<128x256xf32> to vector<128x256xbf16>
    %c0_11 = arith.constant 0 : index
    %c0_12 = arith.constant 0 : index
    %14 = vector.load %arg5[%c0_11, %c0_12] : memref<256x256xbf16, #tpu.memory_space<vmem>>, vector<256x256xbf16>
    %cst_13 = arith.constant dense<0.000000e+00> : vector<128x256xf32>
    %15 = tpu.matmul %13, %14, %cst_13 {dimension_numbers = #tpu.dot_dimension_numbers<[1], [0], [0], [1], [0, 0, 1, 1], [], []>} : vector<128x256xbf16>, vector<256x256xbf16>, vector<128x256xf32> -> vector<128x256xf32>
    %c0_14 = arith.constant 0 : index
    %c0_15 = arith.constant 0 : index
    %16 = vector.load %arg6[%c0_14, %c0_15] : memref<1x256xf32, #tpu.memory_space<vmem>>, vector<1x256xf32>
    %17 = vector.broadcast %16 : vector<1x256xf32> to vector<128x256xf32>
    %18 = arith.addf %15, %17 : vector<128x256xf32>
    %19 = arith.truncf %18 : vector<128x256xf32> to vector<128x256xbf16>
    %cst_16 = arith.constant dense<0.000000e+00> : vector<128x256xf32>
    %20 = tpu.matmul %3, %19, %cst_16 {dimension_numbers = #tpu.dot_dimension_numbers<[1], [0], [0], [1], [0, 0, 1, 1], [], []>} : vector<128x128xbf16>, vector<128x256xbf16>, vector<128x256xf32> -> vector<128x256xf32>
    %cst_17 = arith.constant 0.000000e+00 : f32
    %21 = vector.broadcast %cst_17 : f32 to vector<128x256xf32>
    %22 = arith.maximumf %20, %21 : vector<128x256xf32>
    %23 = arith.truncf %22 : vector<128x256xf32> to vector<128x256xbf16>
    %c0_18 = arith.constant 0 : index
    %c0_19 = arith.constant 0 : index
    %24 = vector.load %arg7[%c0_18, %c0_19] : memref<256x256xbf16, #tpu.memory_space<vmem>>, vector<256x256xbf16>
    %cst_20 = arith.constant dense<0.000000e+00> : vector<128x256xf32>
    %25 = tpu.matmul %23, %24, %cst_20 {dimension_numbers = #tpu.dot_dimension_numbers<[1], [0], [0], [1], [0, 0, 1, 1], [], []>} : vector<128x256xbf16>, vector<256x256xbf16>, vector<128x256xf32> -> vector<128x256xf32>
    %c0_21 = arith.constant 0 : index
    %c0_22 = arith.constant 0 : index
    %26 = vector.load %arg8[%c0_21, %c0_22] : memref<1x256xf32, #tpu.memory_space<vmem>>, vector<1x256xf32>
    %27 = vector.broadcast %26 : vector<1x256xf32> to vector<128x256xf32>
    %28 = arith.addf %25, %27 : vector<128x256xf32>
    %29 = arith.truncf %28 : vector<128x256xf32> to vector<128x256xbf16>
    %cst_23 = arith.constant dense<0.000000e+00> : vector<128x256xf32>
    %30 = tpu.matmul %3, %29, %cst_23 {dimension_numbers = #tpu.dot_dimension_numbers<[1], [0], [0], [1], [0, 0, 1, 1], [], []>} : vector<128x128xbf16>, vector<128x256xbf16>, vector<128x256xf32> -> vector<128x256xf32>
    %cst_24 = arith.constant 0.000000e+00 : f32
    %31 = vector.broadcast %cst_24 : f32 to vector<128x256xf32>
    %32 = arith.maximumf %30, %31 : vector<128x256xf32>
    %33 = arith.truncf %32 : vector<128x256xf32> to vector<128x256xbf16>
    %c0_25 = arith.constant 0 : index
    %c0_26 = arith.constant 0 : index
    %34 = vector.load %arg9[%c0_25, %c0_26] : memref<256x256xbf16, #tpu.memory_space<vmem>>, vector<256x256xbf16>
    %cst_27 = arith.constant dense<0.000000e+00> : vector<128x256xf32>
    %35 = tpu.matmul %33, %34, %cst_27 {dimension_numbers = #tpu.dot_dimension_numbers<[1], [0], [0], [1], [0, 0, 1, 1], [], []>} : vector<128x256xbf16>, vector<256x256xbf16>, vector<128x256xf32> -> vector<128x256xf32>
    %c0_28 = arith.constant 0 : index
    %c0_29 = arith.constant 0 : index
    %36 = vector.load %arg10[%c0_28, %c0_29] : memref<1x256xf32, #tpu.memory_space<vmem>>, vector<1x256xf32>
    %37 = vector.broadcast %36 : vector<1x256xf32> to vector<128x256xf32>
    %38 = arith.addf %35, %37 : vector<128x256xf32>
    %39 = vector.shape_cast %38 : vector<128x256xf32> to vector<8x16x256xf32>
    %40 = arith.truncf %39 : vector<8x16x256xf32> to vector<8x16x256xbf16>
    %c0_30 = arith.constant 0 : index
    %c0_31 = arith.constant 0 : index
    %c0_32 = arith.constant 0 : index
    %41 = vector.load %arg11[%c0_30, %c0_31, %c0_32] : memref<8x16x256xbf16, #tpu.memory_space<vmem>>, vector<8x16x256xbf16>
    tpu.vector_store %arg11[%c0_30, %c0_31, %c0_32], %40 {strides = array<i32>} : memref<8x16x256xbf16, #tpu.memory_space<vmem>>, vector<8x16x256xbf16>,
    return
  }
  func.func @transform_0(%arg0: i32) -> (i32, i32, i32) {
    %c0_i32 = arith.constant 0 : i32
    %c0_i32_0 = arith.constant 0 : i32
    %c0_i32_1 = arith.constant 0 : i32
    return %arg0, %c0_i32, %c0_i32_0 : i32, i32, i32
  }
  func.func @transform_1(%arg0: i32) -> (i32, i32, i32) {
    %c0_i32 = arith.constant 0 : i32
    %c0_i32_0 = arith.constant 0 : i32
    %c0_i32_1 = arith.constant 0 : i32
    return %arg0, %c0_i32, %c0_i32_0 : i32, i32, i32
  }
  func.func @transform_2(%arg0: i32) -> (i32, i32) {
    %c0_i32 = arith.constant 0 : i32
    %c0_i32_0 = arith.constant 0 : i32
    %c0_i32_1 = arith.constant 0 : i32
    return %c0_i32, %c0_i32_0 : i32, i32
  }
  func.func @transform_3(%arg0: i32) -> (i32, i32) {
    %c0_i32 = arith.constant 0 : i32
    %c0_i32_0 = arith.constant 0 : i32
    %c0_i32_1 = arith.constant 0 : i32
    return %c0_i32, %c0_i32_0 : i32, i32
  }
  func.func @transform_4(%arg0: i32) -> (i32, i32) {
    %c0_i32 = arith.constant 0 : i32
    %c0_i32_0 = arith.constant 0 : i32
    %c0_i32_1 = arith.constant 0 : i32
    return %c0_i32, %c0_i32_0 : i32, i32
  }
  func.func @transform_5(%arg0: i32) -> (i32, i32) {
    %c0_i32 = arith.constant 0 : i32
    %c0_i32_0 = arith.constant 0 : i32
    %c0_i32_1 = arith.constant 0 : i32
    return %c0_i32, %c0_i32_0 : i32, i32
  }
  func.func @transform_6(%arg0: i32) -> (i32, i32) {
    %c0_i32 = arith.constant 0 : i32
    %c0_i32_0 = arith.constant 0 : i32
    %c0_i32_1 = arith.constant 0 : i32
    return %c0_i32, %c0_i32_0 : i32, i32
  }
  func.func @transform_7(%arg0: i32) -> (i32, i32) {
    %c0_i32 = arith.constant 0 : i32
    %c0_i32_0 = arith.constant 0 : i32
    %c0_i32_1 = arith.constant 0 : i32
    return %c0_i32, %c0_i32_0 : i32, i32
  }
  func.func @transform_8(%arg0: i32) -> (i32, i32) {
    %c0_i32 = arith.constant 0 : i32
    %c0_i32_0 = arith.constant 0 : i32
    %c0_i32_1 = arith.constant 0 : i32
    return %c0_i32, %c0_i32_0 : i32, i32
  }
  func.func @transform_9(%arg0: i32) -> (i32, i32) {
    %c0_i32 = arith.constant 0 : i32
    %c0_i32_0 = arith.constant 0 : i32
    %c0_i32_1 = arith.constant 0 : i32
    return %c0_i32, %c0_i32_0 : i32, i32
  }
  func.func @transform_10(%arg0: i32) -> (i32, i32, i32) {
    %c0_i32 = arith.constant 0 : i32
    %c0_i32_0 = arith.constant 0 : i32
    %c0_i32_1 = arith.constant 0 : i32
    return %arg0, %c0_i32, %c0_i32_0 : i32, i32, i32
  }
}

</mosaic_0001>

<bundles_post_ra>
// kernel: tpu_custom_call.1
= control target key start
LH: loop header
LB: loop body
LE: loop exit
PB: predicated region body
PF: predicated region fallthrough
CT: control target
= control target key end

     0   :  { %s4387_s0 = inlined_call_operand.hbm [shape: bf16[16,16,128], index: 0, kind: input, shape index: {}]   ;;  %s4388_s1 = inlined_call_operand.hbm [shape: bf16[2,128,128], index: 1, kind: input, shape index: {}]   ;;  %s4389_s2 = inlined_call_operand.hbm [shape: bf16[128,256], index: 2, kind: input, shape index: {}]   ;;  %s4390_s3 = inlined_call_operand.vmem [shape: f32[1,256], index: 3, kind: input, shape index: {}]   ;;  %s4391_s4 = inlined_call_operand.hbm [shape: bf16[256,256], index: 4, kind: input, shape index: {}]   ;;  %s4392_s5 = inlined_call_operand.vmem [shape: f32[1,256], index: 5, kind: input, shape index: {}]   ;;  %s4393_s6 = inlined_call_operand.hbm [shape: bf16[256,256], index: 6, kind: input, shape index: {}]   ;;  %s4394_s7 = inlined_call_operand.vmem [shape: f32[1,256], index: 7, kind: input, shape index: {}]   ;;  %s4395_s8 = inlined_call_operand.hbm [shape: bf16[256,256], index: 8, kind: input, shape index: {}]   ;;  %s4396_s9 = inlined_call_operand.vmem [shape: f32[1,256], index: 9, kind: input, shape index: {}]   ;;  %s4397_s10 = inlined_call_operand.hbm [shape: bf16[16,16,256], index: 10, kind: output, shape index: {}]  }
   0x1   :  { %4419 = sst [smem:[#allocation35_spill]] %s4387_s0 }
   0x2   :  { %4420 = sst [smem:[#allocation36_spill]] %s4389_s2 }
   0x3   :  { %4421 = sst [smem:[#allocation37_spill]] %s4391_s4 }
   0x4   :  { %4422 = sst [smem:[#allocation38_spill]] %s4393_s6 }
   0x5   :  { %4423 = sst [smem:[#allocation39_spill]] %s4395_s8 }
   0x6   :  { %15 = vsyncpa [#allocation3], 0 }
   0x7   :  { %17 = vsyncpa [#allocation3 + $0x1], 0 }
   0x8   :  { %18 = vsyncpa [#allocation6], 0 }
   0x9   :  { %20 = vsyncpa [#allocation6 + $0x1], 0 }
   0xa   :  { %21 = vsyncpa [#allocation9], 0 }
   0xb   :  { %22 = vsyncpa [#allocation12], 0 }
   0xc   :  { %23 = vsyncpa [#allocation4], 0 }
   0xd   :  { %25 = vsyncpa [#allocation4 + $0x1], 0  ;;  %s3778_s13 = smov 0   ;;  %s3780_s14 = smov 0  }
   0xe   :  { %s3782_s15 = smov 0   ;;  %s3784_s16 = smov 0  }
   0xf LB: > { %4424 = sst [smem:[#allocation20_spill]] %s3707_s15  ;;  %s3799_s17 = sadd.s32 4294967295, %s3711_s16   ;;  %s3711_s16 = sphi %s3784_s16, %s4472_s16   ;;  %s3707_s15 = sphi %s3782_s15, %s4474_s15   ;;  %s3703_s14 = sphi %s3780_s14, %s4476_s14   ;;  %s3699_s13 = sphi %s3778_s13, %s4475_s13  }
  0x10   : > { %s2670_s18 = sadd.s32 4294967294, %s3711_s16   ;;  %p51_p0 = scmp.ne.s32.totalorder %s3703_s14, %s3699_s13 }
  0x11   : > { %p52_p1 = scmp.eq.s32.totalorder %s3799_s17, 0  ;;  %p269_p2 = scmp.eq.s32.totalorder %s3799_s17, 1 }
  0x12   : > { %p275_p3 = scmp.eq.s32.totalorder %s2670_s18, 1  ;;  %p2671_p5 = scmp.ge.s32.totalorder %s3711_s16, 1 }
  0x13   : > { %p3808_p4 = por %p52_p1, %p51_p0  ;;  %p282_p7 = scmp.lt.s32.totalorder %s3711_s16, 3 }
  0x14   : > { %p3813_p6 = por %p275_p3, %p51_p0  ;;  %s4428_s2 = sld [smem:[#allocation36_spill]] }
  0x15   : > { %p3821_p8 = pnand %p2671_p5, %p282_p7  ;;  %s3713_s25 = smov [#allocation7]  }
  0x16   : > { %s4426_s20 = scalar_select %p3813_p6, 1, 0 }
  0x17   : > { %p3365_p9 = pneg %p3821_p8  ;;  %s295_s26 = sshll.u32 %s3713_s25, 4  ;;  %s296_s26 = int_to_ptr.vmem [resolvable:$true] %s295_s26 }
  0x18   : > { %4427 = sst [smem:[#allocation21_spill]] %s4426_s20  ;;  %s3714_s11 = smov 128  }
  0x19   : > { %p3829_p10 = pnand %p3365_p9, %p52_p1  ;;  %s4431_s4 = sld [smem:[#allocation37_spill]] }
  0x1a   : > { %s293_s23 = sshll.u32 %s4428_s2, 4  ;;  %s3715_s12 = smov 8   ;;  %s294_s23 = int_to_ptr.hbm [resolvable:$true] %s293_s23 }
  0x1b   : > { %3368 = dma.hbm_to_vmem [thread:$0]  (!%p3829_p10), %s294_s23, 2048, %s296_s26, [#allocation6], %s3714_s11, %s3714_s11, %s3715_s12  }
  0x1c   : > { %s3716_s18 = smov [#allocation8]   ;;  %s4432_s6 = sld [smem:[#allocation38_spill]] }
  0x1d   : > { %s312_s21 = sshll.u32 %s3716_s18, 4  ;;  %s4433_s8 = sld [smem:[#allocation39_spill]]  ;;  %s313_s21 = int_to_ptr.vmem [resolvable:$true] %s312_s21 }
  0x1e   : > { %s3717_s26 = smov [#allocation10]   ;;  %s3718_s22 = smov [#allocation11]  }
  0x1f   : > { %s310_s30 = sshll.u32 %s4431_s4, 4  ;;  %s329_s18 = sshll.u32 %s3717_s26, 4  ;;  %s311_s30 = int_to_ptr.hbm [resolvable:$true] %s310_s30  ;;  %s330_s18 = int_to_ptr.vmem [resolvable:$true] %s329_s18 }
  0x20   : > { %3371 = dma.hbm_to_vmem [thread:$0]  (!%p3829_p10), %s311_s30, 4096, %s313_s21, [#allocation9], %s3714_s11, %s3714_s11, %s3715_s12  }
  0x21   : > { %s346_s25 = sshll.u32 %s3718_s22, 4  ;;  %s3852_s30 = sadd.s32 1, %s3711_s16   ;;  %s347_s25 = int_to_ptr.vmem [resolvable:$true] %s346_s25 }
  0x22   : > { %s327_s2 = sshll.u32 %s4432_s6, 4  ;;  %4434 = sst [smem:[#allocation22_spill]] %s3852_s30  ;;  %s328_s2 = int_to_ptr.hbm [resolvable:$true] %s327_s2 }
  0x23   : > { %s344_s23 = sshll.u32 %s4433_s8, 4  ;;  %s38_s21 = sadd.s32 1, %s3707_s15  ;;  %s345_s23 = int_to_ptr.hbm [resolvable:$true] %s344_s23 }
  0x24   : > { %3374 = dma.hbm_to_vmem [thread:$0]  (!%p3829_p10), %s328_s2, 4096, %s330_s18, [#allocation9], %s3714_s11, %s3714_s11, %s3715_s12  }
  0x25   : > { %3377 = dma.hbm_to_vmem [thread:$0]  (!%p3829_p10), %s345_s23, 4096, %s347_s25, [#allocation12], %s3714_s11, %s3714_s11, %s3715_s12  }
  0x26   : > { %s35_s28 = ssub.s32 %s3711_s16, %s3852_s30  ;;  %p45_p12 = scmp.ne.s32.totalorder %s3707_s15, %s3703_s14 }
  0x27   : > { %p36_p13 = scmp.eq.s32.totalorder %s35_s28, 0  ;;  %p46_p0 = scmp.eq.s32.totalorder %s3711_s16, 0 }
  0x28   : > { %p3862_p3 = por %p269_p2, %p45_p12  ;;  %p3393_p5 = scmp.lt.s32.totalorder %s3711_s16, 2 }
  0x29   : > { %s3868_s2 = scalar_select %p36_p13, %s3707_s15, %s38_s21  }
  0x2a   : > { %p47_p7 = por %p46_p0, %p45_p12  ;;  %s363_s26 = sand.u32 1, %s3707_s15  }
  0x2b   : > { %4436 = sst [smem:[#allocation23_spill]] %s3868_s2  ;;  %s3871_s27 = sshll.u32 %s363_s26, 6 }
  0x2c   : > { %s4398_s11 = sshll.u32 %s3711_s16, 6  ;;  %s4437_s0 = sld [smem:[#allocation35_spill]] }
  0x2d   : > { %s367_s22 = scalar_lea.vmem [#allocation2], %s3871_s27  ;;  %p3880_p2 = pnand %p3393_p5, %p47_p7 }
  0x2e   : > { %s376_s25 = sshll.u32 %s367_s22, 4  ;;  %s364_s21 = scalar_lea.sflag [#allocation3], %s363_s26  ;;  %s377_s25 = int_to_ptr.vmem [resolvable:$true] %s376_s25 }
  0x2f   : > { %p3573_p10 = pneg %p3880_p2 }
  0x32   : > { %s373_s18 = scalar_lea.hbm %s4437_s0, %s4398_s11 }
  0x33   : > { %s374_s28 = sshll.u32 %s373_s18, 4  ;;  %s3576_s18 = scalar_lea.hbm %s4437_s0, 128  ;;  %s375_s28 = int_to_ptr.hbm [resolvable:$true] %s374_s28 }
  0x34   : > { %s3569_s6 = sshra.s32 %s375_s28, 4  ;;  %s3570_s6 = int_to_ptr.hbm [resolvable:$true] %s3569_s6 }
  0x35   : > { %s3571_s8 = scalar_lea.hbm %s3570_s6, 64  ;;  %p3577_p0 = scmp.lt.s32.totalorder %s3570_s6, %s4437_s0 }
  0x36   : > { %p3572_p9 = scmp.ne.s32.totalorder %s3570_s6, %s3571_s8  ;;  %p3578_p5 = scmp.lt.s32.totalorder %s3576_s18, %s3571_s8 }
  0x38   : > { %p3574_p12 = pnand %p3573_p10, %p3572_p9  ;;  %p3579_p7 = por %p3578_p5, %p3577_p0 }
  0x3a   : > { %p3575_p13 = pneg %p3574_p12 }
  0x3c   : > { %p3580_p11 = pnand %p3579_p7, %p3575_p13 }
  0x3e   : > { %3583 = shalt.err (!%p3580_p11)
}
  0x3f   : > { %s3719_s26 = smov 64   ;;  %s3720_s2 = smov 4  }
  0x40   : > { %3381 = dma.hbm_to_vmem [thread:$0]  (!%p3880_p2), %s375_s28, 1024, %s377_s25, %s364_s21, %s3719_s26, %s3719_s26, %s3720_s2  }
  0x41   : > { %s4439_s15 = sshll.u32 %s3711_s16, 6  ;;  %s390_s11 = scalar_lea.vmem [#allocation5], %s3871_s27 }
  0x42   : > { %s395_s30 = scalar_lea.hbm %s4388_s1, %s4439_s15  ;;  %s398_s6 = sshll.u32 %s390_s11, 4  ;;  %s399_s6 = int_to_ptr.vmem [resolvable:$true] %s398_s6 }
  0x43   : > { %s396_s8 = sshll.u32 %s395_s30, 4  ;;  %s386_s18 = sand.u32 1, %s3711_s16   ;;  %s397_s8 = int_to_ptr.hbm [resolvable:$true] %s396_s8 }
  0x44   : > { %s387_s22 = scalar_lea.sflag [#allocation6], %s386_s18  ;;  %s3599_s0 = sshra.s32 %s397_s8, 4  ;;  %s3600_s0 = int_to_ptr.hbm [resolvable:$true] %s3599_s0 }
  0x45   : > { %s3601_s20 = scalar_lea.hbm %s3600_s0, 64  ;;  %s3606_s21 = scalar_lea.hbm %s4388_s1, 128 }
  0x46   : > { %p3602_p11 = scmp.ne.s32.totalorder %s3600_s0, %s3601_s20  ;;  %p3607_p13 = scmp.lt.s32.totalorder %s3600_s0, %s4388_s1 }
  0x47   : > { %p3608_p0 = scmp.lt.s32.totalorder %s3606_s21, %s3601_s20 }
  0x48   : > { %p3604_p9 = pnand %p3602_p11, %p3573_p10 }
  0x49   : > { %p3609_p5 = por %p3608_p0, %p3607_p13 }
  0x4a   : > { %p3605_p12 = pneg %p3604_p9 }
  0x4c   : > { %p3610_p7 = pnand %p3609_p5, %p3605_p12 }
  0x4e   : > { %3613 = shalt.err (!%p3610_p7)
}
  0x4f   : > { %3384 = dma.hbm_to_vmem [thread:$0]  (!%p3880_p2), %s397_s8, 1024, %s399_s6, %s387_s22, %s3719_s26, %s3719_s26, %s3720_s2  }
  0x50   : > { %410 = sbr.rel (%p3821_p8) target bundleno = 1677 (0x68d), region = 60 }
  0x55   : > { %s3918_s30 = sand.u32 1, %s3703_s14  }
  0x56   : > { %s2685_s12 = sshll.u32 %s3918_s30, 6  ;;  %s413_s23 = scalar_lea.sflag [#allocation3], %s3918_s30 }
  0x57   : > { %s3922_s11 = scalar_lea.vmem [#allocation2], %s2685_s12 }
  0x58   : > { %3674 = dma.done.wait (%p3808_p4), %s413_s23, 1024  }
  0x59   : > { %3676 = vsyncadd (%p3808_p4), %s413_s23, 4294966272  ;;  %s422_s0 = sand.u32 1, %s3799_s17   ;;  %s3929_s20 = scalar_lea.vmem [#allocation5], %s2685_s12 }
  0x5a   : > { %s423_s4 = scalar_lea.sflag [#allocation6], %s422_s0 }
  0x5b   : > { %3678 = dma.done.wait (%p3808_p4), %s423_s4, 1024  }
  0x5c   : > { %3680 = vsyncadd (%p3808_p4), %s423_s4, 4294966272 }
  0x5d   : > { %3682 = dma.done.wait (%p52_p1), [#allocation6], 2048  }
  0x5e   : > { %3684 = vsyncadd (%p52_p1), [#allocation6], 4294965248 }
  0x5f   : > { %3686 = dma.done.wait (%p52_p1), [#allocation9], 8192  }
  0x60   : > { %3688 = vsyncadd (%p52_p1), [#allocation9], 4294959104 }
  0x61   : > { %3690 = dma.done.wait (%p52_p1), [#allocation12], 4096  }
  0x62   : > { %3692 = vsyncadd (%p52_p1), [#allocation12], 4294963200  ;;  %v2782_v0 = vld [vmem:[#allocation7 + $0x70] sm:$0xf]  ;;  %v3244_v1 = vld [vmem:[#allocation7 + $0x74] sm:$0xf0] }
  0x63   : > { %v3243_v2 = vld [vmem:[#allocation7 + $0x74] sm:$0xf]  ;;  %v2783_v3 = vor.u32 %v3244_v1, %v2782_v0  ;;  %v2784_v4 = vld [vmem:[#allocation7 + $0x78] sm:$0xf0]  ;;  %v2774_v5 = vld [vmem:[#allocation7 + $0x60] sm:$0xf] }
  0x64   : > { %v3242_v6 = vld [vmem:[#allocation7 + $0x64] sm:$0xf0]  ;;  %v2787_v7 = vor.u32 %v3243_v2, %v2784_v4  ;;  %v3241_v8 = vld [vmem:[#allocation7 + $0x64] sm:$0xf]  ;;  %v2776_v9 = vld [vmem:[#allocation7 + $0x68] sm:$0xf0] }
  0x65   : > { %673 = vmatpush.bf16.msra.mxu0 %v2783_v3  ;;  %v2775_v10 = vor.u32 %v3242_v6, %v2774_v5  ;;  %v2779_v11 = vor.u32 %v3241_v8, %v2776_v9  ;;  %v2766_v12 = vld [vmem:[#allocation7 + $0x50] sm:$0xf]  ;;  %v3240_v13 = vld [vmem:[#allocation7 + $0x54] sm:$0xf0]  ;;  %v3239_v14 = vld [vmem:[#allocation7 + $0x54] sm:$0xf] }
  0x66   : > { %722 = vmatpush.bf16.msra.mxu1 %v2787_v7  ;;  %v2768_v15 = vld [vmem:[#allocation7 + $0x58] sm:$0xf0]  ;;  %v2767_v16 = vor.u32 %v3240_v13, %v2766_v12  ;;  %v2758_v18 = vld [vmem:[#allocation7 + $0x40] sm:$0xf]  ;;  %v3238_v19 = vld [vmem:[#allocation7 + $0x44] sm:$0xf0] }
  0x67   : > { %v2771_v17 = vor.u32 %v3239_v14, %v2768_v15  ;;  %v3237_v20 = vld [vmem:[#allocation7 + $0x44] sm:$0xf]  ;;  %v2760_v21 = vld [vmem:[#allocation7 + $0x48] sm:$0xf0]  ;;  %v2759_v22 = vor.u32 %v3238_v19, %v2758_v18  ;;  %v2750_v24 = vld [vmem:[#allocation7 + $0x30] sm:$0xf] }
  0x68   : > { %v2763_v23 = vor.u32 %v3237_v20, %v2760_v21  ;;  %v3236_v25 = vld [vmem:[#allocation7 + $0x34] sm:$0xf0]  ;;  %v3235_v26 = vld [vmem:[#allocation7 + $0x34] sm:$0xf]  ;;  %v2752_v27 = vld [vmem:[#allocation7 + $0x38] sm:$0xf0] }
  0x69   : > { %674 = vmatpush.bf16.msra.mxu0 %v2775_v10  ;;  %v2751_v28 = vor.u32 %v3236_v25, %v2750_v24  ;;  %v2755_v29 = vor.u32 %v3235_v26, %v2752_v27  ;;  %v2742_v30 = vld [vmem:[#allocation7 + $0x20] sm:$0xf]  ;;  %v3234_v31 = vld [vmem:[#allocation7 + $0x24] sm:$0xf0]  ;;  %v3233_v32 = vld [vmem:[#allocation7 + $0x24] sm:$0xf] }
  0x6a   : > { %723 = vmatpush.bf16.msra.mxu1 %v2779_v11  ;;  %v2744_v33 = vld [vmem:[#allocation7 + $0x28] sm:$0xf0]  ;;  %v2743_v34 = vor.u32 %v3234_v31, %v2742_v30  ;;  %v2734_v36 = vld [vmem:[#allocation7 + $0x10] sm:$0xf]  ;;  %v3232_v37 = vld [vmem:[#allocation7 + $0x14] sm:$0xf0] }
  0x6b   : > { %v2747_v35 = vor.u32 %v3233_v32, %v2744_v33  ;;  %v3231_v38 = vld [vmem:[#allocation7 + $0x14] sm:$0xf]  ;;  %v2736_v39 = vld [vmem:[#allocation7 + $0x18] sm:$0xf0]  ;;  %v2735_v40 = vor.u32 %v3232_v37, %v2734_v36  ;;  %v2726_v42 = vld [vmem:[#allocation7] sm:$0xf] }
  0x6c   : > { %v2739_v41 = vor.u32 %v3231_v38, %v2736_v39  ;;  %v3230_v43 = vld [vmem:[#allocation7 + $0x4] sm:$0xf0]  ;;  %v3229_v44 = vld [vmem:[#allocation7 + $0x4] sm:$0xf]  ;;  %v2728_v45 = vld [vmem:[#allocation7 + $0x8] sm:$0xf0] }
  0x6d   : > { %675 = vmatpush.bf16.msra.mxu0 %v2767_v16  ;;  %v2727_v46 = vor.u32 %v3230_v43, %v2726_v42  ;;  %v2731_v47 = vor.u32 %v3229_v44, %v2728_v45  ;;  %v3213_v48 = vld [vmem:[%s3922_s11] sm:$0xff]  ;;  %v3214_v49 = vld [vmem:[%s3922_s11 + $0x8] sm:$0xff]  ;;  %v3215_v50 = vld [vmem:[%s3922_s11 + $0x10] sm:$0xff]  ;;  %s2691_s25 = sshll.u32 %s3918_s30, 7  ;;  %s3342_s21 = sshll.u32 %s3799_s17, 7 }
  0x6e   : > { %724 = vmatpush.bf16.msra.mxu1 %v2771_v17  ;;  %v3216_v51 = vld [vmem:[%s3922_s11 + $0x18] sm:$0xff]  ;;  %v3217_v52 = vld [vmem:[%s3922_s11 + $0x20] sm:$0xff]  ;;  %v3218_v53 = vld [vmem:[%s3922_s11 + $0x28] sm:$0xff]  ;;  %s4305_s28 = scalar_lea.vmem [#allocation13], %s2691_s25  ;;  %s2532_s12 = scalar_lea.hbm %s4397_s10, %s3342_s21 }
  0x6f   : > { %v3219_v54 = vld [vmem:[%s3922_s11 + $0x30] sm:$0xff]  ;;  %v3220_v55 = vld [vmem:[%s3922_s11 + $0x38] sm:$0xff]  ;;  %s2533_s23 = sshll.u32 %s4305_s28, 4  ;;  %s2535_s11 = sshll.u32 %s2532_s12, 4  ;;  %s2534_s23 = int_to_ptr.vmem [resolvable:$true] %s2533_s23  ;;  %s2536_s11 = int_to_ptr.hbm [resolvable:$true] %s2535_s11 }
  0x70   : > { %s2520_s17 = scalar_lea.sflag [#allocation4], %s3918_s30  ;;  %s3643_s0 = sshra.s32 %s2536_s11, 4  ;;  %s3644_s0 = int_to_ptr.hbm [resolvable:$true] %s3643_s0 }
  0x71   : > { %676 = vmatpush.bf16.msra.mxu0 %v2759_v22  ;;  %v539_v22 = vld [vmem:[%s4390_s3] sm:$0x3]  ;;  %s3645_s4 = scalar_lea.hbm %s3644_s0, 128  ;;  %s3649_s24 = scalar_lea.hbm %s4397_s10, 256 }
  0x72   : > { %725 = vmatpush.bf16.msra.mxu1 %v2763_v23  ;;  %v541_v23 = vperm.slane %v539_v22, 0  ;;  %v542_v24 = vperm.slane %v539_v22, 1  ;;  %v3259_v22 = vld [vmem:[#allocation8 + $0x74] sm:$0xf]  ;;  %p3646_p1 = scmp.ne.s32.totalorder %s3644_s0, %s3645_s4  ;;  %p3650_p2 = scmp.lt.s32.totalorder %s3644_s0, %s4397_s10 }
  0x73   : > { %p3651_p10 = scmp.lt.s32.totalorder %s3649_s24, %s3645_s4 }
  0x74   : > { %p3647_p4 = pnand %p3646_p1, %p3862_p3 }
  0x75   : > { %677 = vmatpush.bf16.msra.mxu0 %v2751_v28  ;;  %p3652_p11 = por %p3651_p10, %p3650_p2 }
  0x76   : > { %726 = vmatpush.bf16.msra.mxu1 %v2755_v29  ;;  %p3648_p8 = pneg %p3647_p4 }
  0x78   : > { %p3653_p9 = pnand %p3652_p11, %p3648_p8 }
  0x79   : > { %678 = vmatpush.bf16.msra.mxu0 %v2743_v34 }
  0x7a   : > { %727 = vmatpush.bf16.msra.mxu1 %v2747_v35 }
  0x7d   : > { %679 = vmatpush.bf16.msra.mxu0 %v2735_v40 }
  0x7e   : > { %728 = vmatpush.bf16.msra.mxu1 %v2739_v41 }
  0x81   : > { %680 = vmatpush.bf16.msra.mxu0 %v2727_v46 }
  0x82   : > { %729 = vmatpush.bf16.msra.mxu1 %v2731_v47 }
  0x84   : > { %681 = vmatmul.bf16.vlgmr.msra.gmra.mxu0 %v3213_v48 }
  0x85   : > { %730 = vmatmul.bf16.vlgmr.msra.gmra.mxu1 %v3213_v48 }
  0x94   : > { %686 = vmatmul.bf16.gmra.mxu0 %v3214_v49 }
  0x95   : > { %735 = vmatmul.bf16.gmra.mxu1 %v3214_v49 }
  0xa4   : > { %691 = vmatmul.bf16.gmra.mxu0 %v3215_v50 }
  0xa5   : > { %740 = vmatmul.bf16.gmra.mxu1 %v3215_v50 }
  0xb4   : > { %696 = vmatmul.bf16.gmra.mxu0 %v3216_v51 }
  0xb5   : > { %745 = vmatmul.bf16.gmra.mxu1 %v3216_v51 }
  0xc4   : > { %701 = vmatmul.bf16.gmra.mxu0 %v3217_v52 }
  0xc5   : > { %750 = vmatmul.bf16.gmra.mxu1 %v3217_v52 }
  0xd4   : > { %706 = vmatmul.bf16.gmra.mxu0 %v3218_v53 }
  0xd5   : > { %755 = vmatmul.bf16.gmra.mxu1 %v3218_v53 }
  0xe4   : > { %711 = vmatmul.bf16.gmra.mxu0 %v3219_v54 }
  0xe5   : > { %760 = vmatmul.bf16.gmra.mxu1 %v3219_v54 }
  0xf4   : > { %716 = vmatmul.bf16.gmra.mxu0 %v3220_v55 }
  0xf5   : > { %765 = vmatmul.bf16.gmra.mxu1 %v3220_v55 }
 0x101   : > { %v3955_v56 = vpop.f32.mrf.mxu0 }
 0x102   : > { %v3957_v57 = vpop.f32.mrf.mxu1 }
 0x109   : > { %v3959_v58 = vpop.f32.mrf.mxu0 }
 0x10a   : > { %v3961_v59 = vpop.f32.mrf.mxu1 }
 0x111   : > { %v3963_v60 = vpop.f32.mrf.mxu0 }
 0x112   : > { %v3965_v61 = vpop.f32.mrf.mxu1 }
 0x119   : > { %v3967_v62 = vpop.f32.mrf.mxu0 }
 0x11a   : > { %v3969_v63 = vpop.f32.mrf.mxu1 }
 0x121   : > { %v3971_v0 = vpop.f32.mrf.mxu0 }
 0x122   : > { %v3973_v1 = vpop.f32.mrf.mxu1 }
 0x129   : > { %v694_v2 = vpop.f32.mrf.mxu0 }
 0x12a   : > { %v743_v3 = vpop.f32.mrf.mxu1  ;;  %v695_v55 = vadd.f32 %v694_v2, %v541_v23  ;;  %v737_v2 = vadd.f32 %v3965_v61, %v542_v24  ;;  %v3989_v61 = vld [vmem:[%s3929_s20] sm:$0xff] }
 0x12b   : > { %4440 = vst [vmem:[#allocation24_spill] sm:$0xff] %v3989_v61 }
 0x131   : > { %v697_v4 = vpop.f32.mrf.mxu0 }
 0x132   : > { %v746_v5 = vpop.f32.mrf.mxu1  ;;  %v698_v53 = vadd.f32 %v697_v4, %v541_v23 }
 0x133   : > { %v747_v54 = vadd.f32 %v746_v5, %v542_v24  ;;  %v688_v5 = vadd.f32 %v3963_v60, %v541_v23 }
 0x139   : > { %v699_v6 = vpop.f32.mrf.mxu0 }
 0x13a   : > { %v748_v7 = vpop.f32.mrf.mxu1  ;;  %v700_v49 = vadd.f32 %v699_v6, %v541_v23 }
 0x13b   : > { %v749_v51 = vadd.f32 %v748_v7, %v542_v24  ;;  %v739_v7 = vadd.f32 %v3969_v63, %v542_v24  ;;  %v732_v63 = vadd.f32 %v3957_v57, %v542_v24  ;;  %v4004_v57 = vld [vmem:[%s3929_s20 + $0x18] sm:$0xff] }
 0x13c   : > { %4443 = vst [vmem:[#allocation27_spill] sm:$0xff] %v4004_v57 }
 0x141   : > { %v702_v8 = vpop.f32.mrf.mxu0 }
 0x142   : > { %v751_v9 = vpop.f32.mrf.mxu1  ;;  %v703_v47 = vadd.f32 %v702_v8, %v541_v23  ;;  %v742_v8 = vadd.f32 %v3973_v1, %v542_v24  ;;  %v734_v1 = vadd.f32 %v3961_v59, %v542_v24  ;;  %v4009_v59 = vld [vmem:[%s3929_s20 + $0x20] sm:$0xff] }
 0x143   : > { %v752_v48 = vadd.f32 %v751_v9, %v542_v24  ;;  %v690_v9 = vadd.f32 %v3967_v62, %v541_v23  ;;  %v683_v62 = vadd.f32 %v3955_v56, %v541_v23  ;;  %v3999_v56 = vld [vmem:[%s3929_s20 + $0x10] sm:$0xff]  ;;  %4444 = vst [vmem:[#allocation28_spill] sm:$0xff] %v4009_v59 }
 0x144   : > { %4442 = vst [vmem:[#allocation26_spill] sm:$0xff] %v3999_v56 }
 0x149   : > { %v704_v10 = vpop.f32.mrf.mxu0 }
 0x14a   : > { %v753_v11 = vpop.f32.mrf.mxu1  ;;  %v705_v43 = vadd.f32 %v704_v10, %v541_v23  ;;  %v693_v10 = vadd.f32 %v3971_v0, %v541_v23  ;;  %v685_v0 = vadd.f32 %v3959_v58, %v541_v23  ;;  %v3994_v58 = vld [vmem:[%s3929_s20 + $0x8] sm:$0xff] }
 0x14b   : > { %v754_v45 = vadd.f32 %v753_v11, %v542_v24  ;;  %v774_v11 = vpack.c.bf16 %v739_v7, %v737_v2  ;;  %4441 = vst [vmem:[#allocation25_spill] sm:$0xff] %v3994_v58  ;;  %v3252_v2 = vld [vmem:[#allocation8 + $0x34] sm:$0xf0] }
 0x14c   : > { %v779_v50 = vpack.c.bf16 %v705_v43, %v703_v47  ;;  %v775_v6 = vpack.c.bf16 %v695_v55, %v693_v10  ;;  %v771_v60 = vpack.c.bf16 %v685_v0, %v683_v62  ;;  %v2926_v43 = vld [vmem:[#allocation8 + $0xd0] sm:$0xf]  ;;  %v2864_v47 = vld [vmem:[#allocation8 + $0x58] sm:$0xf0]  ;;  %v3269_v10 = vld [vmem:[#allocation8 + $0xc4] sm:$0xf] }
 0x14d   : > { %v780_v52 = vpack.c.bf16 %v754_v45, %v752_v48  ;;  %v3255_v45 = vld [vmem:[#allocation8 + $0x54] sm:$0xf]  ;;  %v2910_v0 = vld [vmem:[#allocation8 + $0xb0] sm:$0xf]  ;;  %v2848_v62 = vld [vmem:[#allocation8 + $0x38] sm:$0xf0] }
 0x14e   : > { %v3271_v48 = vld [vmem:[#allocation8 + $0xd4] sm:$0xf] }
 0x151   : > { %v707_v12 = vpop.f32.mrf.mxu0 }
 0x152   : > { %v756_v13 = vpop.f32.mrf.mxu1  ;;  %v708_v41 = vadd.f32 %v707_v12, %v541_v23  ;;  %v777_v12 = vpack.c.bf16 %v700_v49, %v698_v53  ;;  %v2928_v49 = vld [vmem:[#allocation8 + $0xd8] sm:$0xf0]  ;;  %v3254_v53 = vld [vmem:[#allocation8 + $0x44] sm:$0xf0] }
 0x153   : > { %v757_v42 = vadd.f32 %v756_v13, %v542_v24  ;;  %v744_v13 = vadd.f32 %v743_v3, %v542_v24  ;;  %v773_v3 = vpack.c.bf16 %v690_v9, %v688_v5  ;;  %v2931_v55 = vor.u32 %v3271_v48, %v2928_v49  ;;  %v4019_v9 = vld [vmem:[%s3929_s20 + $0x30] sm:$0xff]  ;;  %v3262_v49 = vld [vmem:[#allocation8 + $0x84] sm:$0xf0] }
 0x154   : > { %4446 = vst [vmem:[#allocation30_spill] sm:$0xff] %v4019_v9  ;;  %v2846_v5 = vld [vmem:[#allocation8 + $0x30] sm:$0xf] }
 0x155   : > { %v776_v4 = vpack.c.bf16 %v744_v13, %v742_v8  ;;  %v3253_v13 = vld [vmem:[#allocation8 + $0x44] sm:$0xf]  ;;  %v2920_v8 = vld [vmem:[#allocation8 + $0xc8] sm:$0xf0] }
 0x159   : > { %v709_v14 = vpop.f32.mrf.mxu0 }
 0x15a   : > { %v758_v15 = vpop.f32.mrf.mxu1  ;;  %v710_v37 = vadd.f32 %v709_v14, %v541_v23  ;;  %v778_v14 = vpack.c.bf16 %v749_v51, %v747_v54  ;;  %v2867_v51 = vor.u32 %v3255_v45, %v2864_v47  ;;  %v2918_v54 = vld [vmem:[#allocation8 + $0xc0] sm:$0xf] }
 0x15b   : > { %v759_v39 = vadd.f32 %v758_v15, %v542_v24  ;;  %v772_v15 = vpack.c.bf16 %v734_v1, %v732_v63  ;;  %v3268_v1 = vld [vmem:[#allocation8 + $0xb4] sm:$0xf0]  ;;  %v3267_v63 = vld [vmem:[#allocation8 + $0xb4] sm:$0xf]  ;;  %v2822_v45 = vld [vmem:[#allocation8] sm:$0xf] }
 0x15c   : > { %v781_v44 = vpack.c.bf16 %v710_v37, %v708_v41  ;;  %v3273_v37 = vld [vmem:[#allocation8 + $0xe4] sm:$0xf]  ;;  %v3256_v41 = vld [vmem:[#allocation8 + $0x54] sm:$0xf0]  ;;  %v2886_v47 = vld [vmem:[#allocation8 + $0x80] sm:$0xf] }
 0x15d   : > { %v782_v46 = vpack.c.bf16 %v759_v39, %v757_v42  ;;  %v2936_v39 = vld [vmem:[#allocation8 + $0xe8] sm:$0xf0] }
 0x15e   : > { %v2939_v42 = vor.u32 %v3273_v37, %v2936_v39  ;;  %v2832_v39 = vld [vmem:[#allocation8 + $0x18] sm:$0xf0] }
 0x161   : > { %v712_v16 = vpop.f32.mrf.mxu0 }
 0x162   : > { %v761_v17 = vpop.f32.mrf.mxu1  ;;  %v713_v35 = vadd.f32 %v712_v16, %v541_v23  ;;  %v4014_v16 = vld [vmem:[%s3929_s20 + $0x28] sm:$0xff] }
 0x163   : > { %v762_v36 = vadd.f32 %v761_v17, %v542_v24  ;;  %4445 = vst [vmem:[#allocation29_spill] sm:$0xff] %v4014_v16  ;;  %v2878_v17 = vld [vmem:[#allocation8 + $0x70] sm:$0xf] }
 0x169   : > { %v714_v18 = vpop.f32.mrf.mxu0 }
 0x16a   : > { %v763_v19 = vpop.f32.mrf.mxu1  ;;  %v715_v31 = vadd.f32 %v714_v18, %v541_v23  ;;  %v3260_v18 = vld [vmem:[#allocation8 + $0x74] sm:$0xf0] }
 0x16b   : > { %v764_v33 = vadd.f32 %v763_v19, %v542_v24  ;;  %v2942_v19 = vld [vmem:[#allocation8 + $0xf0] sm:$0xf] }
 0x16c   : > { %v783_v38 = vpack.c.bf16 %v715_v31, %v713_v35  ;;  %v2934_v31 = vld [vmem:[#allocation8 + $0xe0] sm:$0xf]  ;;  %v3257_v35 = vld [vmem:[#allocation8 + $0x64] sm:$0xf] }
 0x16d   : > { %v784_v40 = vpack.c.bf16 %v764_v33, %v762_v36  ;;  %v2872_v36 = vld [vmem:[#allocation8 + $0x68] sm:$0xf0] }
 0x171   : > { %v717_v20 = vpop.f32.mrf.mxu0 }
 0x172   : > { %v766_v21 = vpop.f32.mrf.mxu1  ;;  %v718_v26 = vadd.f32 %v717_v20, %v541_v23  ;;  %v2879_v20 = vor.u32 %v3260_v18, %v2878_v17  ;;  %v2911_v17 = vor.u32 %v3268_v1, %v2910_v0 }
 0x173   : > { %v767_v29 = vadd.f32 %v766_v21, %v542_v24  ;;  %v3276_v21 = vld [vmem:[#allocation8 + $0xf4] sm:$0xf0] }
 0x174   : > { %1179 = vmatpush.bf16.msrb.mxu0 %v2879_v20  ;;  %v2838_v20 = vld [vmem:[#allocation8 + $0x20] sm:$0xf] }
 0x179   : > { %v719_v25 = vpop.f32.mrf.mxu0 }
 0x17a   : > { %v720_v27 = vadd.f32 %v719_v25, %v541_v23  ;;  %v768_v28 = vpop.f32.mrf.mxu1  ;;  %v2880_v23 = vld [vmem:[#allocation8 + $0x78] sm:$0xf0] }
 0x17b   : > { %v769_v30 = vadd.f32 %v768_v28, %v542_v24  ;;  %v2943_v24 = vor.u32 %v3276_v21, %v2942_v19  ;;  %v2883_v25 = vor.u32 %v3259_v22, %v2880_v23  ;;  %v2870_v28 = vld [vmem:[#allocation8 + $0x60] sm:$0xf]  ;;  %v3250_v21 = vld [vmem:[#allocation8 + $0x24] sm:$0xf0] }
 0x17c   : > { %v785_v32 = vpack.c.bf16 %v720_v27, %v718_v26  ;;  %v3275_v26 = vld [vmem:[#allocation8 + $0xf4] sm:$0xf]  ;;  %v2944_v27 = vld [vmem:[#allocation8 + $0xf8] sm:$0xf0]  ;;  %v2902_v22 = vld [vmem:[#allocation8 + $0xa0] sm:$0xf]  ;;  %v2839_v23 = vor.u32 %v3250_v21, %v2838_v20 }
 0x17d   : > { %v786_v34 = vpack.c.bf16 %v769_v30, %v767_v29  ;;  %v2947_v29 = vor.u32 %v3275_v26, %v2944_v27  ;;  %v3258_v30 = vld [vmem:[#allocation8 + $0x64] sm:$0xf0]  ;;  %1228 = vmatpush.bf16.msrb.mxu1 %v2943_v24  ;;  %v2840_v26 = vld [vmem:[#allocation8 + $0x28] sm:$0xf0] }
 0x17e   : > { %835 = vmatpush.bf16.msra.mxu2 %v785_v32  ;;  %v3274_v32 = vld [vmem:[#allocation8 + $0xe4] sm:$0xf0]  ;;  %v2871_v33 = vor.u32 %v3258_v30, %v2870_v28  ;;  %v2904_v30 = vld [vmem:[#allocation8 + $0xa8] sm:$0xf0] }
 0x17f   : > { %884 = vmatpush.bf16.msra.mxu3 %v786_v34  ;;  %v2935_v34 = vor.u32 %v3274_v32, %v2934_v31  ;;  %v3266_v24 = vld [vmem:[#allocation8 + $0xa4] sm:$0xf0]  ;;  %v2830_v31 = vld [vmem:[#allocation8 + $0x10] sm:$0xf] }
 0x180   : > { %1180 = vmatpush.bf16.msrb.mxu0 %v2871_v33  ;;  %v2903_v27 = vor.u32 %v3266_v24, %v2902_v22  ;;  %v3248_v33 = vld [vmem:[#allocation8 + $0x14] sm:$0xf0] }
 0x181   : > { %1229 = vmatpush.bf16.msrb.mxu1 %v2935_v34  ;;  %v2894_v34 = vld [vmem:[#allocation8 + $0x90] sm:$0xf] }
 0x182   : > { %836 = vmatpush.bf16.msra.mxu2 %v783_v38  ;;  %v2875_v38 = vor.u32 %v3257_v35, %v2872_v36  ;;  %v3264_v35 = vld [vmem:[#allocation8 + $0x94] sm:$0xf0]  ;;  %v2831_v36 = vor.u32 %v3248_v33, %v2830_v31 }
 0x183   : > { %885 = vmatpush.bf16.msra.mxu3 %v784_v40  ;;  %v2862_v40 = vld [vmem:[#allocation8 + $0x50] sm:$0xf]  ;;  %v2895_v37 = vor.u32 %v3264_v35, %v2894_v34 }
 0x186   : > { %837 = vmatpush.bf16.msra.mxu2 %v781_v44  ;;  %v3272_v44 = vld [vmem:[#allocation8 + $0xd4] sm:$0xf0] }
 0x187   : > { %886 = vmatpush.bf16.msra.mxu3 %v782_v46  ;;  %v2863_v46 = vor.u32 %v3256_v41, %v2862_v40  ;;  %v3263_v40 = vld [vmem:[#allocation8 + $0x94] sm:$0xf] }
 0x189   : > { %1181 = vmatpush.bf16.msrb.mxu0 %v2863_v46  ;;  %v3246_v46 = vld [vmem:[#allocation8 + $0x4] sm:$0xf0] }
 0x18a   : > { %838 = vmatpush.bf16.msra.mxu2 %v779_v50  ;;  %v2927_v50 = vor.u32 %v3272_v44, %v2926_v43  ;;  %v4024_v44 = vld [vmem:[%s3929_s20 + $0x38] sm:$0xff]  ;;  %v2823_v48 = vor.u32 %v3246_v46, %v2822_v45 }
 0x18b   : > { %887 = vmatpush.bf16.msra.mxu3 %v780_v52  ;;  %v2854_v52 = vld [vmem:[#allocation8 + $0x40] sm:$0xf]  ;;  %4447 = vst [vmem:[#allocation31_spill] sm:$0xff] %v4024_v44 }
 0x18c   : > { %1230 = vmatpush.bf16.msrb.mxu1 %v2927_v50  ;;  %v3245_v50 = vld [vmem:[#allocation8 + $0x4] sm:$0xf] }
 0x18e   : > { %839 = vmatpush.bf16.msra.mxu2 %v777_v12  ;;  %v3270_v12 = vld [vmem:[#allocation8 + $0xc4] sm:$0xf0] }
 0x18f   : > { %888 = vmatpush.bf16.msra.mxu3 %v778_v14  ;;  %v2856_v14 = vld [vmem:[#allocation8 + $0x48] sm:$0xf0]  ;;  %v2919_v7 = vor.u32 %v3270_v12, %v2918_v54  ;;  %v3261_v54 = vld [vmem:[#allocation8 + $0x84] sm:$0xf] }
 0x191   : > { %1231 = vmatpush.bf16.msrb.mxu1 %v2919_v7 }
 0x192   : > { %840 = vmatpush.bf16.msra.mxu2 %v775_v6  ;;  %v2855_v6 = vor.u32 %v3254_v53, %v2854_v52  ;;  %v2887_v52 = vor.u32 %v3262_v49, %v2886_v47 }
 0x193   : > { %889 = vmatpush.bf16.msra.mxu3 %v776_v4  ;;  %v2859_v4 = vor.u32 %v3253_v13, %v2856_v14 }
 0x194   : > { %1182 = vmatpush.bf16.msrb.mxu0 %v2855_v6 }
 0x195   : > { %1232 = vmatpush.bf16.msrb.mxu1 %v2911_v17 }
 0x196   : > { %841 = vmatpush.bf16.msra.mxu2 %v773_v3  ;;  %v2923_v3 = vor.u32 %v3269_v10, %v2920_v8 }
 0x197   : > { %890 = vmatpush.bf16.msra.mxu3 %v774_v11  ;;  %v3251_v11 = vld [vmem:[#allocation8 + $0x34] sm:$0xf] }
 0x198   : > { %v2851_v18 = vor.u32 %v3251_v11, %v2848_v62 }
 0x199   : > { %1233 = vmatpush.bf16.msrb.mxu1 %v2903_v27 }
 0x19a   : > { %842 = vmatpush.bf16.msra.mxu2 %v771_v60  ;;  %v2912_v60 = vld [vmem:[#allocation8 + $0xb8] sm:$0xf0] }
 0x19b   : > { %891 = vmatpush.bf16.msra.mxu3 %v772_v15  ;;  %v2847_v15 = vor.u32 %v3252_v2, %v2846_v5  ;;  %v2915_v19 = vor.u32 %v3267_v63, %v2912_v60 }
 0x19d   : > { %843 = vmatmul.bf16.vlgmr.msra.gmra.mxu2 %v3989_v61  ;;  %1183 = vmatpush.bf16.msrb.mxu0 %v2847_v15 }
 0x19e   : > { %892 = vmatmul.bf16.vlgmr.msra.gmra.mxu3 %v3989_v61  ;;  %1277 = vmatpush.bf16.msrb.mxu2 %v2883_v25  ;;  %v3249_v25 = vld [vmem:[#allocation8 + $0x24] sm:$0xf] }
 0x19f   : > { %1326 = vmatpush.bf16.msrb.mxu3 %v2947_v29  ;;  %v2843_v28 = vor.u32 %v3249_v25, %v2840_v26  ;;  %v3265_v29 = vld [vmem:[#allocation8 + $0xa4] sm:$0xf]  ;;  %1234 = vmatpush.bf16.msrb.mxu1 %v2895_v37 }
 0x1a0   : > { %v2907_v32 = vor.u32 %v3265_v29, %v2904_v30 }
 0x1a1   : > { %1184 = vmatpush.bf16.msrb.mxu0 %v2839_v23 }
 0x1a2   : > { %1278 = vmatpush.bf16.msrb.mxu2 %v2875_v38  ;;  %v3247_v38 = vld [vmem:[#allocation8 + $0x14] sm:$0xf] }
 0x1a3   : > { %1327 = vmatpush.bf16.msrb.mxu3 %v2939_v42  ;;  %v2835_v41 = vor.u32 %v3247_v38, %v2832_v39  ;;  %v2896_v42 = vld [vmem:[#allocation8 + $0x98] sm:$0xf0]  ;;  %1235 = vmatpush.bf16.msrb.mxu1 %v2887_v52 }
 0x1a4   : > { %v2899_v43 = vor.u32 %v3263_v40, %v2896_v42 }
 0x1a5   : > { %1185 = vmatpush.bf16.msrb.mxu0 %v2831_v36 }
 0x1a6   : > { %1279 = vmatpush.bf16.msrb.mxu2 %v2867_v51  ;;  %v2824_v51 = vld [vmem:[#allocation8 + $0x8] sm:$0xf0] }
 0x1a7   : > { %1328 = vmatpush.bf16.msrb.mxu3 %v2931_v55  ;;  %v2827_v53 = vor.u32 %v3245_v50, %v2824_v51  ;;  %v2888_v55 = vld [vmem:[#allocation8 + $0x88] sm:$0xf0] }
 0x1a8   : > { %v2891_v12 = vor.u32 %v3261_v54, %v2888_v55 }
 0x1a9   : > { %1186 = vmatpush.bf16.msrb.mxu0 %v2823_v48 }
 0x1aa   : > { %1280 = vmatpush.bf16.msrb.mxu2 %v2859_v4 }
 0x1ab   : > { %1329 = vmatpush.bf16.msrb.mxu3 %v2923_v3 }
 0x1ad   : > { %848 = vmatmul.bf16.gmra.mxu2 %v3994_v58 }
 0x1ae   : > { %897 = vmatmul.bf16.gmra.mxu3 %v3994_v58  ;;  %1281 = vmatpush.bf16.msrb.mxu2 %v2851_v18 }
 0x1af   : > { %1330 = vmatpush.bf16.msrb.mxu3 %v2915_v19 }
 0x1b2   : > { %1282 = vmatpush.bf16.msrb.mxu2 %v2843_v28 }
 0x1b3   : > { %1331 = vmatpush.bf16.msrb.mxu3 %v2907_v32 }
 0x1b6   : > { %1283 = vmatpush.bf16.msrb.mxu2 %v2835_v41 }
 0x1b7   : > { %1332 = vmatpush.bf16.msrb.mxu3 %v2899_v43 }
 0x1ba   : > { %1284 = vmatpush.bf16.msrb.mxu2 %v2827_v53 }
 0x1bb   : > { %1333 = vmatpush.bf16.msrb.mxu3 %v2891_v12 }
 0x1bd   : > { %853 = vmatmul.bf16.gmra.mxu2 %v3999_v56 }
 0x1be   : > { %902 = vmatmul.bf16.gmra.mxu3 %v3999_v56 }
 0x1cd   : > { %858 = vmatmul.bf16.gmra.mxu2 %v4004_v57 }
 0x1ce   : > { %907 = vmatmul.bf16.gmra.mxu3 %v4004_v57 }
 0x1dd   : > { %863 = vmatmul.bf16.gmra.mxu2 %v4009_v59 }
 0x1de   : > { %912 = vmatmul.bf16.gmra.mxu3 %v4009_v59 }
 0x1ed   : > { %868 = vmatmul.bf16.gmra.mxu2 %v4014_v16 }
 0x1ee   : > { %917 = vmatmul.bf16.gmra.mxu3 %v4014_v16 }
 0x1fd   : > { %873 = vmatmul.bf16.gmra.mxu2 %v4019_v9 }
 0x1fe   : > { %922 = vmatmul.bf16.gmra.mxu3 %v4019_v9 }
 0x20d   : > { %878 = vmatmul.bf16.gmra.mxu2 %v4024_v44 }
 0x20e   : > { %927 = vmatmul.bf16.gmra.mxu3 %v4024_v44 }
 0x220   : > { %v844_v13 = vpop.f32.mrf.mxu2 }
 0x221   : > { %v893_v14 = vpop.f32.mrf.mxu3  ;;  %v933_v8 = vmax.f32 %v844_v13, 0.0 }
 0x222   : > { %v934_v4 = vmax.f32 %v893_v14, 0.0 }
 0x228   : > { %v846_v10 = vpop.f32.mrf.mxu2 }
 0x229   : > { %v935_v6 = vmax.f32 %v846_v10, 0.0  ;;  %v895_v7 = vpop.f32.mrf.mxu3 }
 0x22a   : > { %v936_v5 = vmax.f32 %v895_v7, 0.0 }
 0x22b   : > { %v965_v2 = vpack.c.bf16 %v935_v6, %v933_v8 }
 0x22c   : > { %v966_v0 = vpack.c.bf16 %v936_v5, %v934_v4 }
 0x22d   : > { %1187 = vmatmul.bf16.vlgmr.msrb.gmra.mxu0 %v965_v2  ;;  %1285 = vmatmul.bf16.vlgmr.msrb.gmra.mxu2 %v965_v2 }
 0x22e   : > { %1236 = vmatmul.bf16.vlgmr.msrb.gmra.mxu1 %v966_v0  ;;  %1334 = vmatmul.bf16.vlgmr.msrb.gmra.mxu3 %v966_v0 }
 0x230   : > { %v849_v3 = vpop.f32.mrf.mxu2 }
 0x231   : > { %v898_v1 = vpop.f32.mrf.mxu3  ;;  %v937_v62 = vmax.f32 %v849_v3, 0.0 }
 0x232   : > { %v938_v15 = vmax.f32 %v898_v1, 0.0 }
 0x238   : > { %v851_v11 = vpop.f32.mrf.mxu2 }
 0x239   : > { %v939_v63 = vmax.f32 %v851_v11, 0.0  ;;  %v900_v60 = vpop.f32.mrf.mxu3 }
 0x23a   : > { %v940_v17 = vmax.f32 %v900_v60, 0.0 }
 0x23b   : > { %v967_v18 = vpack.c.bf16 %v939_v63, %v937_v62 }
 0x23c   : > { %v968_v19 = vpack.c.bf16 %v940_v17, %v938_v15 }
 0x23d   : > { %1192 = vmatmul.bf16.gmra.mxu0 %v967_v18  ;;  %1290 = vmatmul.bf16.gmra.mxu2 %v967_v18 }
 0x23e   : > { %1241 = vmatmul.bf16.gmra.mxu1 %v968_v19  ;;  %1339 = vmatmul.bf16.gmra.mxu3 %v968_v19 }
 0x240   : > { %v854_v20 = vpop.f32.mrf.mxu2 }
 0x241   : > { %v903_v21 = vpop.f32.mrf.mxu3  ;;  %v941_v23 = vmax.f32 %v854_v20, 0.0 }
 0x242   : > { %v942_v26 = vmax.f32 %v903_v21, 0.0 }
 0x248   : > { %v856_v22 = vpop.f32.mrf.mxu2 }
 0x249   : > { %v943_v24 = vmax.f32 %v856_v22, 0.0  ;;  %v905_v25 = vpop.f32.mrf.mxu3 }
 0x24a   : > { %v944_v27 = vmax.f32 %v905_v25, 0.0 }
 0x24b   : > { %v969_v28 = vpack.c.bf16 %v943_v24, %v941_v23  ;;  %v1013_v24 = vld [vmem:[%s4392_s5] sm:$0x3] }
 0x24c   : > { %v970_v29 = vpack.c.bf16 %v944_v27, %v942_v26  ;;  %v4031_v25 = vperm.slane %v1013_v24, 0 }
 0x24d   : > { %1197 = vmatmul.bf16.gmra.mxu0 %v969_v28  ;;  %1295 = vmatmul.bf16.gmra.mxu2 %v969_v28 }
 0x24e   : > { %1246 = vmatmul.bf16.gmra.mxu1 %v970_v29  ;;  %1344 = vmatmul.bf16.gmra.mxu3 %v970_v29 }
 0x250   : > { %v859_v30 = vpop.f32.mrf.mxu2 }
 0x251   : > { %v908_v31 = vpop.f32.mrf.mxu3  ;;  %v945_v33 = vmax.f32 %v859_v30, 0.0  ;;  %v4036_v30 = vperm.slane %v1013_v24, 1 }
 0x252   : > { %v946_v36 = vmax.f32 %v908_v31, 0.0 }
 0x258   : > { %v861_v32 = vpop.f32.mrf.mxu2 }
 0x259   : > { %v947_v34 = vmax.f32 %v861_v32, 0.0  ;;  %v910_v35 = vpop.f32.mrf.mxu3 }
 0x25a   : > { %v948_v37 = vmax.f32 %v910_v35, 0.0 }
 0x25b   : > { %v971_v38 = vpack.c.bf16 %v947_v34, %v945_v33 }
 0x25c   : > { %v972_v39 = vpack.c.bf16 %v948_v37, %v946_v36 }
 0x25d   : > { %1202 = vmatmul.bf16.gmra.mxu0 %v971_v38  ;;  %1300 = vmatmul.bf16.gmra.mxu2 %v971_v38 }
 0x25e   : > { %1251 = vmatmul.bf16.gmra.mxu1 %v972_v39  ;;  %1349 = vmatmul.bf16.gmra.mxu3 %v972_v39 }
 0x260   : > { %v864_v40 = vpop.f32.mrf.mxu2 }
 0x261   : > { %v913_v41 = vpop.f32.mrf.mxu3  ;;  %v949_v43 = vmax.f32 %v864_v40, 0.0 }
 0x262   : > { %v950_v47 = vmax.f32 %v913_v41, 0.0 }
 0x268   : > { %v866_v42 = vpop.f32.mrf.mxu2 }
 0x269   : > { %v951_v45 = vmax.f32 %v866_v42, 0.0  ;;  %v915_v46 = vpop.f32.mrf.mxu3 }
 0x26a   : > { %v952_v48 = vmax.f32 %v915_v46, 0.0 }
 0x26b   : > { %v973_v49 = vpack.c.bf16 %v951_v45, %v949_v43 }
 0x26c   : > { %v974_v50 = vpack.c.bf16 %v952_v48, %v950_v47 }
 0x26d   : > { %1207 = vmatmul.bf16.gmra.mxu0 %v973_v49  ;;  %1305 = vmatmul.bf16.gmra.mxu2 %v973_v49 }
 0x26e   : > { %1256 = vmatmul.bf16.gmra.mxu1 %v974_v50  ;;  %1354 = vmatmul.bf16.gmra.mxu3 %v974_v50 }
 0x270   : > { %v869_v51 = vpop.f32.mrf.mxu2 }
 0x271   : > { %v918_v52 = vpop.f32.mrf.mxu3  ;;  %v953_v54 = vmax.f32 %v869_v51, 0.0 }
 0x272   : > { %v954_v13 = vmax.f32 %v918_v52, 0.0 }
 0x278   : > { %v871_v53 = vpop.f32.mrf.mxu2 }
 0x279   : > { %v955_v55 = vmax.f32 %v871_v53, 0.0  ;;  %v920_v12 = vpop.f32.mrf.mxu3 }
 0x27a   : > { %v956_v14 = vmax.f32 %v920_v12, 0.0 }
 0x27b   : > { %v975_v10 = vpack.c.bf16 %v955_v55, %v953_v54 }
 0x27c   : > { %v976_v8 = vpack.c.bf16 %v956_v14, %v954_v13 }
 0x27d   : > { %1212 = vmatmul.bf16.gmra.mxu0 %v975_v10  ;;  %1310 = vmatmul.bf16.gmra.mxu2 %v975_v10 }
 0x27e   : > { %1261 = vmatmul.bf16.gmra.mxu1 %v976_v8  ;;  %1359 = vmatmul.bf16.gmra.mxu3 %v976_v8 }
 0x280   : > { %v874_v6 = vpop.f32.mrf.mxu2 }
 0x281   : > { %v923_v7 = vpop.f32.mrf.mxu3  ;;  %v957_v5 = vmax.f32 %v874_v6, 0.0 }
 0x282   : > { %v958_v3 = vmax.f32 %v923_v7, 0.0 }
 0x288   : > { %v876_v4 = vpop.f32.mrf.mxu2 }
 0x289   : > { %v959_v2 = vmax.f32 %v876_v4, 0.0  ;;  %v925_v0 = vpop.f32.mrf.mxu3 }
 0x28a   : > { %v960_v1 = vmax.f32 %v925_v0, 0.0 }
 0x28b   : > { %v977_v11 = vpack.c.bf16 %v959_v2, %v957_v5 }
 0x28c   : > { %v978_v62 = vpack.c.bf16 %v960_v1, %v958_v3 }
 0x28d   : > { %1217 = vmatmul.bf16.gmra.mxu0 %v977_v11  ;;  %1315 = vmatmul.bf16.gmra.mxu2 %v977_v11 }
 0x28e   : > { %1266 = vmatmul.bf16.gmra.mxu1 %v978_v62  ;;  %1364 = vmatmul.bf16.gmra.mxu3 %v978_v62 }
 0x290   : > { %v879_v63 = vpop.f32.mrf.mxu2 }
 0x291   : > { %v928_v60 = vpop.f32.mrf.mxu3  ;;  %v961_v17 = vmax.f32 %v879_v63, 0.0 }
 0x292   : > { %v962_v20 = vmax.f32 %v928_v60, 0.0 }
 0x298   : > { %v881_v15 = vpop.f32.mrf.mxu2 }
 0x299   : > { %v963_v18 = vmax.f32 %v881_v15, 0.0  ;;  %v930_v19 = vpop.f32.mrf.mxu3 }
 0x29a   : > { %v964_v21 = vmax.f32 %v930_v19, 0.0 }
 0x29b   : > { %v979_v22 = vpack.c.bf16 %v963_v18, %v961_v17 }
 0x29c   : > { %v980_v23 = vpack.c.bf16 %v964_v21, %v962_v20 }
 0x29d   : > { %1222 = vmatmul.bf16.gmra.mxu0 %v979_v22  ;;  %1320 = vmatmul.bf16.gmra.mxu2 %v979_v22 }
 0x29e   : > { %1271 = vmatmul.bf16.gmra.mxu1 %v980_v23  ;;  %1369 = vmatmul.bf16.gmra.mxu3 %v980_v23 }
 0x2aa   : > { %v1188_v26 = vpop.f32.mrf.mxu0 }
 0x2ab   : > { %v1189_v27 = vadd.f32 %v1188_v26, %v4031_v25  ;;  %v1237_v28 = vpop.f32.mrf.mxu1 }
 0x2ad   : > { %v4034_v29 = vadd.f32 %v1237_v28, %v1189_v27 }
 0x2b0   : > { %v1286_v31 = vpop.f32.mrf.mxu2 }
 0x2b1   : > { %v1287_v32 = vadd.f32 %v1286_v31, %v4036_v30  ;;  %v1335_v33 = vpop.f32.mrf.mxu3 }
 0x2b2   : > { %v4039_v34 = vpop.f32.mrf.mxu0 }
 0x2b3   : > { %v4041_v35 = vadd.f32 %v1335_v33, %v1287_v32  ;;  %v4043_v36 = vpop.f32.mrf.mxu1 }
 0x2b5   : > { %4448 = vst [vmem:[#allocation32_spill] sm:$0xff] %v4041_v35 }
 0x2b8   : > { %v4045_v37 = vpop.f32.mrf.mxu2 }
 0x2b9   : > { %v4047_v38 = vpop.f32.mrf.mxu3 }
 0x2ba   : > { %4449 = vst [vmem:[#allocation33_spill] sm:$0xff] %v4047_v38  ;;  %v1193_v39 = vpop.f32.mrf.mxu0 }
 0x2bb   : > { %v1194_v40 = vadd.f32 %v1193_v39, %v4031_v25  ;;  %v1242_v41 = vpop.f32.mrf.mxu1 }
 0x2bd   : > { %v4050_v42 = vadd.f32 %v1242_v41, %v1194_v40 }
 0x2c0   : > { %v1291_v43 = vpop.f32.mrf.mxu2 }
 0x2c1   : > { %v1292_v45 = vadd.f32 %v1291_v43, %v4036_v30  ;;  %v1340_v46 = vpop.f32.mrf.mxu3 }
 0x2c2   : > { %v4053_v47 = vpop.f32.mrf.mxu0 }
 0x2c3   : > { %v4055_v48 = vadd.f32 %v1340_v46, %v1292_v45  ;;  %v4057_v49 = vpop.f32.mrf.mxu1 }
 0x2c5   : > { %4450 = vst [vmem:[#allocation34_spill] sm:$0xff] %v4055_v48 }
 0x2c8   : > { %v4059_v50 = vpop.f32.mrf.mxu2 }
 0x2c9   : > { %v4061_v51 = vpop.f32.mrf.mxu3 }
 0x2ca   : > { %v1198_v52 = vpop.f32.mrf.mxu0 }
 0x2cb   : > { %v1199_v53 = vadd.f32 %v1198_v52, %v4031_v25  ;;  %v1247_v54 = vpop.f32.mrf.mxu1 }
 0x2cd   : > { %v4064_v55 = vadd.f32 %v1247_v54, %v1199_v53 }
 0x2d0   : > { %v1296_v12 = vpop.f32.mrf.mxu2 }
 0x2d1   : > { %v1297_v13 = vadd.f32 %v1296_v12, %v4036_v30  ;;  %v1345_v14 = vpop.f32.mrf.mxu3 }
 0x2d2   : > { %v4067_v10 = vpop.f32.mrf.mxu0 }
 0x2d3   : > { %v4069_v8 = vadd.f32 %v1345_v14, %v1297_v13  ;;  %v4071_v6 = vpop.f32.mrf.mxu1 }
 0x2d8   : > { %v4073_v7 = vpop.f32.mrf.mxu2 }
 0x2d9   : > { %v4075_v4 = vpop.f32.mrf.mxu3 }
 0x2da   : > { %v1203_v5 = vpop.f32.mrf.mxu0 }
 0x2db   : > { %v1204_v2 = vadd.f32 %v1203_v5, %v4031_v25  ;;  %v1252_v0 = vpop.f32.mrf.mxu1 }
 0x2dd   : > { %v4078_v3 = vadd.f32 %v1252_v0, %v1204_v2 }
 0x2e0   : > { %v1301_v1 = vpop.f32.mrf.mxu2 }
 0x2e1   : > { %v1302_v11 = vadd.f32 %v1301_v1, %v4036_v30  ;;  %v1350_v62 = vpop.f32.mrf.mxu3 }
 0x2e2   : > { %v4081_v63 = vpop.f32.mrf.mxu0 }
 0x2e3   : > { %v4083_v60 = vadd.f32 %v1350_v62, %v1302_v11  ;;  %v4085_v15 = vpop.f32.mrf.mxu1 }
 0x2e8   : > { %v4087_v17 = vpop.f32.mrf.mxu2 }
 0x2e9   : > { %v4089_v18 = vpop.f32.mrf.mxu3 }
 0x2ea   : > { %v1208_v19 = vpop.f32.mrf.mxu0 }
 0x2eb   : > { %v1209_v20 = vadd.f32 %v1208_v19, %v4031_v25  ;;  %v1257_v21 = vpop.f32.mrf.mxu1 }
 0x2ed   : > { %v4092_v22 = vadd.f32 %v1257_v21, %v1209_v20 }
 0x2f0   : > { %v1306_v23 = vpop.f32.mrf.mxu2 }
 0x2f1   : > { %v1307_v24 = vadd.f32 %v1306_v23, %v4036_v30  ;;  %v1355_v26 = vpop.f32.mrf.mxu3 }
 0x2f2   : > { %v1210_v27 = vpop.f32.mrf.mxu0 }
 0x2f3   : > { %v4095_v28 = vadd.f32 %v1355_v26, %v1307_v24  ;;  %v1259_v31 = vpop.f32.mrf.mxu1 }
 0x2f8   : > { %v1308_v32 = vpop.f32.mrf.mxu2 }
 0x2f9   : > { %v4097_v33 = vpop.f32.mrf.mxu3 }
 0x2fa   : > { %v1213_v39 = vpop.f32.mrf.mxu0 }
 0x2fb   : > { %v1262_v40 = vpop.f32.mrf.mxu1 }
 0x300   : > { %v1311_v41 = vpop.f32.mrf.mxu2 }
 0x301   : > { %v1360_v43 = vpop.f32.mrf.mxu3 }
 0x302   : > { %v1215_v45 = vpop.f32.mrf.mxu0 }
 0x303   : > { %v1264_v46 = vpop.f32.mrf.mxu1  ;;  %v1216_v57 = vadd.f32 %v1215_v45, %v4031_v25 }
 0x308   : > { %v1313_v52 = vpop.f32.mrf.mxu2 }
 0x309   : > { %v1362_v53 = vpop.f32.mrf.mxu3 }
 0x30a   : > { %v1218_v54 = vpop.f32.mrf.mxu0 }
 0x30b   : > { %v1267_v12 = vpop.f32.mrf.mxu1  ;;  %v1219_v9 = vadd.f32 %v1218_v54, %v4031_v25  ;;  %v1265_v54 = vadd.f32 %v1264_v46, %v1216_v57  ;;  %v1309_v46 = vadd.f32 %v1308_v32, %v4036_v30  ;;  %v1196_v32 = vadd.f32 %v4053_v47, %v4031_v25 }
 0x30d   : > { %v1268_v48 = vadd.f32 %v1267_v12, %v1219_v9  ;;  %v1206_v9 = vadd.f32 %v4081_v63, %v4031_v25  ;;  %v1304_v63 = vadd.f32 %v4087_v17, %v4036_v30  ;;  %v1191_v17 = vadd.f32 %v4039_v34, %v4031_v25 }
 0x310   : > { %v1316_v13 = vpop.f32.mrf.mxu2 }
 0x311   : > { %v1365_v14 = vpop.f32.mrf.mxu3 }
 0x312   : > { %v1220_v5 = vpop.f32.mrf.mxu0 }
 0x313   : > { %v1269_v2 = vpop.f32.mrf.mxu1  ;;  %v1221_v24 = vadd.f32 %v1220_v5, %v4031_v25 }
 0x315   : > { %v1270_v56 = vadd.f32 %v1269_v2, %v1221_v24  ;;  %v2998_v24 = vld [vmem:[#allocation10 + $0x60] sm:$0xf] }
 0x317   : > { %v1387_v45 = vpack.c.bf16 %v1270_v56, %v1268_v48  ;;  %v1201_v48 = vadd.f32 %v4067_v10, %v4031_v25 }
 0x318   : > { %v1318_v0 = vpop.f32.mrf.mxu2 }
 0x319   : > { %v1367_v1 = vpop.f32.mrf.mxu3  ;;  %v1319_v38 = vadd.f32 %v1318_v0, %v4036_v30  ;;  %v3291_v0 = vld [vmem:[#allocation10 + $0x74] sm:$0xf] }
 0x31a   : > { %v1223_v11 = vpop.f32.mrf.mxu0 }
 0x31b   : > { %v1272_v62 = vpop.f32.mrf.mxu1  ;;  %v1224_v20 = vadd.f32 %v1223_v11, %v4031_v25  ;;  %v1214_v11 = vadd.f32 %v1213_v39, %v4031_v25 }
 0x31d   : > { %v1273_v16 = vadd.f32 %v1272_v62, %v1224_v20 }
 0x320   : > { %v1321_v19 = vpop.f32.mrf.mxu2 }
 0x321   : > { %v1370_v21 = vpop.f32.mrf.mxu3  ;;  %v1322_v58 = vadd.f32 %v1321_v19, %v4036_v30  ;;  %v1263_v19 = vadd.f32 %v1262_v40, %v1214_v11 }
 0x322   : > { %v1225_v23 = vpop.f32.mrf.mxu0 }
 0x323   : > { %v1226_v26 = vadd.f32 %v1225_v23, %v4031_v25  ;;  %v1274_v44 = vpop.f32.mrf.mxu1  ;;  %v1211_v23 = vadd.f32 %v1210_v27, %v4031_v25  ;;  %v1371_v2 = vadd.f32 %v1370_v21, %v1322_v58  ;;  %v1385_v27 = vpack.c.bf16 %v1265_v54, %v1263_v19  ;;  %v3008_v21 = vld [vmem:[#allocation10 + $0x78] sm:$0xf0] }
 0x324   : > { %v1289_v25 = vadd.f32 %v4045_v37, %v4036_v30  ;;  %v4456_v37 = vld [vmem:[#allocation26_spill] sm:$0xff]  ;;  %v3011_v11 = vor.u32 %v3291_v0, %v3008_v21 }
 0x325   : > { %v1275_v59 = vadd.f32 %v1274_v44, %v1226_v26  ;;  %v1317_v44 = vadd.f32 %v1316_v13, %v4036_v30  ;;  %v3290_v26 = vld [vmem:[#allocation10 + $0x64] sm:$0xf0]  ;;  %v4460_v0 = vld [vmem:[#allocation30_spill] sm:$0xff] }
 0x326   : > { %v2999_v54 = vor.u32 %v3290_v26, %v2998_v24  ;;  %v2958_v21 = vld [vmem:[#allocation10 + $0x10] sm:$0xf]  ;;  %v3280_v24 = vld [vmem:[#allocation10 + $0x14] sm:$0xf0]  ;;  %v3279_v26 = vld [vmem:[#allocation10 + $0x14] sm:$0xf] }
 0x327   : > { %v1389_v35 = vpack.c.bf16 %v1275_v59, %v1273_v16  ;;  %v1314_v59 = vadd.f32 %v1313_v52, %v4036_v30  ;;  %v1368_v16 = vadd.f32 %v1367_v1, %v1319_v38  ;;  %v1366_v57 = vadd.f32 %v1365_v14, %v1317_v44  ;;  %v3292_v14 = vld [vmem:[#allocation10 + $0x74] sm:$0xf0]  ;;  %v3070_v44 = vld [vmem:[#allocation10 + $0xf0] sm:$0xf] }
 0x328   : > { %v1323_v61 = vpop.f32.mrf.mxu2  ;;  %v1255_v38 = vadd.f32 %v4085_v15, %v1206_v9  ;;  %v1299_v15 = vadd.f32 %v4073_v7, %v4036_v30 }
 0x329   : > { %v1324_v5 = vadd.f32 %v1323_v61, %v4036_v30  ;;  %1391 = vmatpush.bf16.msra.mxu0 %v1389_v35  ;;  %v1372_v62 = vpop.f32.mrf.mxu3  ;;  %v1260_v61 = vadd.f32 %v1259_v31, %v1211_v23  ;;  %v1312_v35 = vadd.f32 %v1311_v41, %v4036_v30  ;;  %v1363_v56 = vadd.f32 %v1362_v53, %v1314_v59  ;;  %v3000_v23 = vld [vmem:[#allocation10 + $0x68] sm:$0xf0]  ;;  %v3072_v59 = vld [vmem:[#allocation10 + $0xf8] sm:$0xf0] }
 0x32a   : > { %v1388_v58 = vpack.c.bf16 %v1368_v16, %v1366_v57  ;;  %v1358_v31 = vadd.f32 %v4097_v33, %v1309_v46  ;;  %v1250_v53 = vadd.f32 %v4071_v6, %v1201_v48  ;;  %v1381_v10 = vpack.c.bf16 %v1255_v38, %v4078_v3  ;;  %v2990_v16 = vld [vmem:[#allocation10 + $0x50] sm:$0xf]  ;;  %v3062_v57 = vld [vmem:[#allocation10 + $0xe0] sm:$0xf]  ;;  %v3064_v48 = vld [vmem:[#allocation10 + $0xe8] sm:$0xf0] }
 0x32b   : > { %v1373_v20 = vadd.f32 %v1372_v62, %v1324_v5  ;;  %v1383_v40 = vpack.c.bf16 %v1260_v61, %v4092_v22  ;;  %v1361_v52 = vadd.f32 %v1360_v43, %v1312_v35  ;;  %v1353_v22 = vadd.f32 %v4089_v18, %v1304_v63  ;;  %v3289_v5 = vld [vmem:[#allocation10 + $0x64] sm:$0xf]  ;;  %v3287_v35 = vld [vmem:[#allocation10 + $0x54] sm:$0xf]  ;;  %v3286_v63 = vld [vmem:[#allocation10 + $0x44] sm:$0xf0] }
 0x32c   : > { %v1384_v43 = vpack.c.bf16 %v1358_v31, %v4095_v28  ;;  %v1245_v33 = vadd.f32 %v4057_v49, %v1196_v32  ;;  %v1379_v47 = vpack.c.bf16 %v1250_v53, %v4064_v55  ;;  %v1294_v6 = vadd.f32 %v4059_v50, %v4036_v30  ;;  %v4451_v55 = vld [vmem:[#allocation33_spill] sm:$0xff]  ;;  %v3285_v31 = vld [vmem:[#allocation10 + $0x44] sm:$0xf]  ;;  %v3054_v53 = vld [vmem:[#allocation10 + $0xd0] sm:$0xf] }
 0x32d   : > { %v1390_v39 = vpack.c.bf16 %v1373_v20, %v1371_v2  ;;  %1392 = vmatpush.bf16.msra.mxu0 %v1387_v45  ;;  %v1386_v41 = vpack.c.bf16 %v1363_v56, %v1361_v52  ;;  %v1348_v3 = vadd.f32 %v4075_v4, %v1299_v15  ;;  %v1382_v7 = vpack.c.bf16 %v1353_v22, %v4083_v60  ;;  %v4452_v60 = vld [vmem:[#allocation34_spill] sm:$0xff]  ;;  %v4455_v30 = vld [vmem:[#allocation25_spill] sm:$0xff]  ;;  %v3308_v45 = vld [vmem:[#allocation10 + $0xf4] sm:$0xf0] }
 0x32e   : > { %v1240_v18 = vadd.f32 %v4043_v36, %v1191_v17  ;;  %v1377_v28 = vpack.c.bf16 %v1245_v33, %v4050_v42  ;;  %v1343_v34 = vadd.f32 %v4061_v51, %v1294_v6  ;;  %v1338_v4 = vadd.f32 %v4451_v55, %v1289_v25  ;;  %v4453_v36 = vld [vmem:[#allocation24_spill] sm:$0xff]  ;;  %v3307_v2 = vld [vmem:[#allocation10 + $0xf4] sm:$0xf]  ;;  %v4459_v20 = vld [vmem:[#allocation29_spill] sm:$0xff] }
 0x32f   : > { %1440 = vmatpush.bf16.msra.mxu1 %v1390_v39  ;;  %v1380_v49 = vpack.c.bf16 %v1348_v3, %v4069_v8  ;;  %v4454_v42 = vld [vmem:[#allocation32_spill] sm:$0xff]  ;;  %v3006_v8 = vld [vmem:[#allocation10 + $0x70] sm:$0xf]  ;;  %v3003_v62 = vor.u32 %v3289_v5, %v3000_v23  ;;  %v3071_v19 = vor.u32 %v3308_v45, %v3070_v44  ;;  %v3288_v39 = vld [vmem:[#allocation10 + $0x54] sm:$0xf0]  ;;  %v3075_v9 = vor.u32 %v3307_v2, %v3072_v59 }
 0x330   : > { %v1375_v50 = vpack.c.bf16 %v1240_v18, %v4034_v29  ;;  %v1378_v12 = vpack.c.bf16 %v1343_v34, %v4452_v60  ;;  %v1376_v13 = vpack.c.bf16 %v1338_v4, %v4454_v42  ;;  %v4457_v29 = vld [vmem:[#allocation27_spill] sm:$0xff]  ;;  %v4458_v51 = vld [vmem:[#allocation28_spill] sm:$0xff]  ;;  %v3007_v1 = vor.u32 %v3292_v14, %v3006_v8  ;;  %v3306_v56 = vld [vmem:[#allocation10 + $0xe4] sm:$0xf0] }
 0x331   : > { %1393 = vmatpush.bf16.msra.mxu0 %v1385_v27  ;;  %v2991_v61 = vor.u32 %v3288_v39, %v2990_v16  ;;  %v2992_v27 = vld [vmem:[#allocation10 + $0x58] sm:$0xf0]  ;;  %1784 = vmatpush.bf16.msra.mxu3 %v3071_v19  ;;  %v3063_v38 = vor.u32 %v3306_v56, %v3062_v57  ;;  %v2982_v52 = vld [vmem:[#allocation10 + $0x40] sm:$0xf]  ;;  %v2984_v32 = vld [vmem:[#allocation10 + $0x48] sm:$0xf0] }
 0x332   : > { %1735 = vmatpush.bf16.msra.mxu2 %v3007_v1  ;;  %v2995_v46 = vor.u32 %v3287_v35, %v2992_v27  ;;  %v2987_v15 = vor.u32 %v3285_v31, %v2984_v32  ;;  %v3056_v17 = vld [vmem:[#allocation10 + $0xd8] sm:$0xf0]  ;;  %v2974_v33 = vld [vmem:[#allocation10 + $0x30] sm:$0xf]  ;;  %v3284_v6 = vld [vmem:[#allocation10 + $0x34] sm:$0xf0] }
 0x333   : > { %1441 = vmatpush.bf16.msra.mxu1 %v1388_v58  ;;  %v3305_v58 = vld [vmem:[#allocation10 + $0xe4] sm:$0xf]  ;;  %v3283_v3 = vld [vmem:[#allocation10 + $0x34] sm:$0xf]  ;;  %v2975_v18 = vor.u32 %v3284_v6, %v2974_v33  ;;  %v3046_v25 = vld [vmem:[#allocation10 + $0xc0] sm:$0xf] }
 0x334   : > { %v3302_v34 = vld [vmem:[#allocation10 + $0xc4] sm:$0xf0]  ;;  %v3048_v55 = vld [vmem:[#allocation10 + $0xc8] sm:$0xf0]  ;;  %v2966_v60 = vld [vmem:[#allocation10 + $0x20] sm:$0xf] }
 0x335   : > { %1394 = vmatpush.bf16.msra.mxu0 %v1383_v40  ;;  %v3067_v40 = vor.u32 %v3305_v58, %v3064_v48  ;;  %1785 = vmatpush.bf16.msra.mxu3 %v3063_v38  ;;  %v3299_v8 = vld [vmem:[#allocation10 + $0xb4] sm:$0xf]  ;;  %v3040_v14 = vld [vmem:[#allocation10 + $0xb8] sm:$0xf0]  ;;  %v3297_v44 = vld [vmem:[#allocation10 + $0xa4] sm:$0xf] }
 0x336   : > { %1736 = vmatpush.bf16.msra.mxu2 %v2999_v54  ;;  %v3043_v1 = vor.u32 %v3299_v8, %v3040_v14  ;;  %v2960_v5 = vld [vmem:[#allocation10 + $0x18] sm:$0xf0]  ;;  %v3030_v54 = vld [vmem:[#allocation10 + $0xa0] sm:$0xf]  ;;  %v3032_v2 = vld [vmem:[#allocation10 + $0xa8] sm:$0xf0] }
 0x337   : > { %1442 = vmatpush.bf16.msra.mxu1 %v1386_v41  ;;  %v2983_v41 = vor.u32 %v3286_v63, %v2982_v52  ;;  %v2963_v23 = vor.u32 %v3279_v26, %v2960_v5  ;;  %v2950_v19 = vld [vmem:[#allocation10] sm:$0xf]  ;;  %v3278_v59 = vld [vmem:[#allocation10 + $0x4] sm:$0xf0]  ;;  %v3277_v16 = vld [vmem:[#allocation10 + $0x4] sm:$0xf] }
 0x338   : > { %v2951_v39 = vor.u32 %v3278_v59, %v2950_v19  ;;  %v3022_v35 = vld [vmem:[#allocation10 + $0x90] sm:$0xf]  ;;  %v3296_v27 = vld [vmem:[#allocation10 + $0x94] sm:$0xf0]  ;;  %v3295_v57 = vld [vmem:[#allocation10 + $0x94] sm:$0xf] }
 0x339   : > { %1395 = vmatpush.bf16.msra.mxu0 %v1381_v10  ;;  %v3304_v10 = vld [vmem:[#allocation10 + $0xd4] sm:$0xf0]  ;;  %v3024_v56 = vld [vmem:[#allocation10 + $0x98] sm:$0xf0]  ;;  %v3014_v48 = vld [vmem:[#allocation10 + $0x80] sm:$0xf] }
 0x33a   : > { %1737 = vmatpush.bf16.msra.mxu2 %v2991_v61  ;;  %v3055_v22 = vor.u32 %v3304_v10, %v3054_v53  ;;  %v3027_v58 = vor.u32 %v3295_v57, %v3024_v56  ;;  %v3294_v38 = vld [vmem:[#allocation10 + $0x84] sm:$0xf0]  ;;  %v3016_v63 = vld [vmem:[#allocation10 + $0x88] sm:$0xf0] }
 0x33b   : > { %1443 = vmatpush.bf16.msra.mxu1 %v1384_v43  ;;  %v3303_v43 = vld [vmem:[#allocation10 + $0xd4] sm:$0xf]  ;;  %v3015_v52 = vor.u32 %v3294_v38, %v3014_v48 }
 0x33c   : > { %1786 = vmatpush.bf16.msra.mxu3 %v3055_v22 }
 0x33d   : > { %1396 = vmatpush.bf16.msra.mxu0 %v1379_v47  ;;  %v3059_v47 = vor.u32 %v3303_v43, %v3056_v17 }
 0x33e   : > { %1738 = vmatpush.bf16.msra.mxu2 %v2983_v41  ;;  %v4461_v41 = vld [vmem:[#allocation31_spill] sm:$0xff] }
 0x33f   : > { %1444 = vmatpush.bf16.msra.mxu1 %v1382_v7  ;;  %v2976_v7 = vld [vmem:[#allocation10 + $0x38] sm:$0xf0] }
 0x341   : > { %1397 = vmatpush.bf16.msra.mxu0 %v1377_v28  ;;  %v2979_v28 = vor.u32 %v3283_v3, %v2976_v7 }
 0x342   : > { %1739 = vmatpush.bf16.msra.mxu2 %v2975_v18 }
 0x343   : > { %1445 = vmatpush.bf16.msra.mxu1 %v1380_v49  ;;  %v3301_v49 = vld [vmem:[#allocation10 + $0xc4] sm:$0xf] }
 0x344   : > { %v3051_v4 = vor.u32 %v3301_v49, %v3048_v55 }
 0x345   : > { %1398 = vmatpush.bf16.msra.mxu0 %v1375_v50  ;;  %v3047_v50 = vor.u32 %v3302_v34, %v3046_v25 }
 0x347   : > { %1446 = vmatpush.bf16.msra.mxu1 %v1378_v12  ;;  %v3282_v12 = vld [vmem:[#allocation10 + $0x24] sm:$0xf0]  ;;  %1787 = vmatpush.bf16.msra.mxu3 %v3047_v50 }
 0x348   : > { %1399 = vmatmul.bf16.vlgmr.msra.gmra.mxu0 %v4453_v36  ;;  %v2967_v42 = vor.u32 %v3282_v12, %v2966_v60 }
 0x349   : > { %1833 = vmatpush.bf16.msrb.mxu0 %v3011_v11  ;;  %v2959_v11 = vor.u32 %v3280_v24, %v2958_v21 }
 0x34a   : > { %1740 = vmatpush.bf16.msra.mxu2 %v2967_v42 }
 0x34b   : > { %1447 = vmatpush.bf16.msra.mxu1 %v1376_v13  ;;  %v2968_v13 = vld [vmem:[#allocation10 + $0x28] sm:$0xf0] }
 0x34d   : > { %1834 = vmatpush.bf16.msrb.mxu0 %v3003_v62  ;;  %v3298_v62 = vld [vmem:[#allocation10 + $0xa4] sm:$0xf0] }
 0x34e   : > { %1448 = vmatmul.bf16.vlgmr.msra.gmra.mxu1 %v4453_v36  ;;  %v3281_v36 = vld [vmem:[#allocation10 + $0x24] sm:$0xf]  ;;  %1741 = vmatpush.bf16.msra.mxu2 %v2959_v11  ;;  %v3031_v45 = vor.u32 %v3298_v62, %v3030_v54 }
 0x34f   : > { %1882 = vmatpush.bf16.msrb.mxu1 %v3075_v9  ;;  %v2952_v9 = vld [vmem:[#allocation10 + $0x8] sm:$0xf0] }
 0x350   : > { %v2955_v61 = vor.u32 %v3277_v16, %v2952_v9 }
 0x351   : > { %1835 = vmatpush.bf16.msrb.mxu0 %v2995_v46  ;;  %v3023_v46 = vor.u32 %v3296_v27, %v3022_v35 }
 0x352   : > { %1742 = vmatpush.bf16.msra.mxu2 %v2951_v39 }
 0x353   : > { %1883 = vmatpush.bf16.msrb.mxu1 %v3067_v40  ;;  %v3293_v40 = vld [vmem:[#allocation10 + $0x84] sm:$0xf] }
 0x354   : > { %v3019_v31 = vor.u32 %v3293_v40, %v3016_v63 }
 0x355   : > { %1836 = vmatpush.bf16.msrb.mxu0 %v2987_v15 }
 0x357   : > { %1884 = vmatpush.bf16.msrb.mxu1 %v3059_v47 }
 0x358   : > { %1404 = vmatmul.bf16.gmra.mxu0 %v4455_v30 }
 0x359   : > { %1837 = vmatpush.bf16.msrb.mxu0 %v2979_v28 }
 0x35b   : > { %1885 = vmatpush.bf16.msrb.mxu1 %v3051_v4 }
 0x35e   : > { %1453 = vmatmul.bf16.gmra.mxu1 %v4455_v30  ;;  %v3038_v30 = vld [vmem:[#allocation10 + $0xb0] sm:$0xf] }
 0x35f   : > { %1886 = vmatpush.bf16.msrb.mxu1 %v3043_v1 }
 0x368   : > { %1409 = vmatmul.bf16.gmra.mxu0 %v4456_v37 }
 0x36e   : > { %1458 = vmatmul.bf16.gmra.mxu1 %v4456_v37  ;;  %v3300_v37 = vld [vmem:[#allocation10 + $0xb4] sm:$0xf0] }
 0x378   : > { %1414 = vmatmul.bf16.gmra.mxu0 %v4457_v29 }
 0x37e   : > { %1463 = vmatmul.bf16.gmra.mxu1 %v4457_v29  ;;  %v2971_v29 = vor.u32 %v3281_v36, %v2968_v13 }
 0x380   : > { %1838 = vmatpush.bf16.msrb.mxu0 %v2971_v29 }
 0x384   : > { %1839 = vmatpush.bf16.msrb.mxu0 %v2963_v23 }
 0x388   : > { %1419 = vmatmul.bf16.gmra.mxu0 %v4458_v51 }
 0x389   : > { %1840 = vmatpush.bf16.msrb.mxu0 %v2955_v61 }
 0x38e   : > { %1468 = vmatmul.bf16.gmra.mxu1 %v4458_v51  ;;  %v3039_v51 = vor.u32 %v3300_v37, %v3038_v30 }
 0x390   : > { %1788 = vmatpush.bf16.msra.mxu3 %v3039_v51 }
 0x394   : > { %1789 = vmatpush.bf16.msra.mxu3 %v3031_v45 }
 0x398   : > { %1424 = vmatmul.bf16.gmra.mxu0 %v4459_v20  ;;  %1790 = vmatpush.bf16.msra.mxu3 %v3023_v46 }
 0x39c   : > { %1791 = vmatpush.bf16.msra.mxu3 %v3015_v52 }
 0x39e   : > { %1473 = vmatmul.bf16.gmra.mxu1 %v4459_v20  ;;  %v3035_v20 = vor.u32 %v3297_v44, %v3032_v2 }
 0x3a0   : > { %1887 = vmatpush.bf16.msrb.mxu1 %v3035_v20 }
 0x3a4   : > { %1888 = vmatpush.bf16.msrb.mxu1 %v3027_v58 }
 0x3a8   : > { %1429 = vmatmul.bf16.gmra.mxu0 %v4460_v0  ;;  %1889 = vmatpush.bf16.msrb.mxu1 %v3019_v31 }
 0x3ae   : > { %1478 = vmatmul.bf16.gmra.mxu1 %v4460_v0 }
 0x3b8   : > { %1434 = vmatmul.bf16.gmra.mxu0 %v4461_v41 }
 0x3be   : > { %1483 = vmatmul.bf16.gmra.mxu1 %v4461_v41 }
 0x3c5   : > { %v1400_v32 = vpop.f32.mrf.mxu0 }
 0x3c6   : > { %v1489_v15 = vmax.f32 %v1400_v32, 0.0 }
 0x3cb   : > { %v1449_v53 = vpop.f32.mrf.mxu1 }
 0x3cc   : > { %v1490_v33 = vmax.f32 %v1449_v53, 0.0 }
 0x3cd   : > { %v1402_v10 = vpop.f32.mrf.mxu0 }
 0x3ce   : > { %v1491_v22 = vmax.f32 %v1402_v10, 0.0 }
 0x3d0   : > { %v1521_v43 = vpack.c.bf16 %v1491_v22, %v1489_v15 }
 0x3d2   : > { %1743 = vmatmul.bf16.vlgmr.msra.gmra.mxu2 %v1521_v43  ;;  %1841 = vmatmul.bf16.vlgmr.msrb.gmra.mxu0 %v1521_v43 }
 0x3d3   : > { %v1451_v17 = vpop.f32.mrf.mxu1 }
 0x3d4   : > { %v1492_v47 = vmax.f32 %v1451_v17, 0.0 }
 0x3d5   : > { %v1405_v6 = vpop.f32.mrf.mxu0 }
 0x3d6   : > { %v1522_v3 = vpack.c.bf16 %v1492_v47, %v1490_v33  ;;  %v1493_v28 = vmax.f32 %v1405_v6, 0.0 }
 0x3d8   : > { %1792 = vmatmul.bf16.vlgmr.msra.gmra.mxu3 %v1522_v3  ;;  %1890 = vmatmul.bf16.vlgmr.msrb.gmra.mxu1 %v1522_v3 }
 0x3db   : > { %v1454_v7 = vpop.f32.mrf.mxu1 }
 0x3dc   : > { %v1494_v50 = vmax.f32 %v1454_v7, 0.0 }
 0x3dd   : > { %v1407_v18 = vpop.f32.mrf.mxu0 }
 0x3de   : > { %v1495_v25 = vmax.f32 %v1407_v18, 0.0 }
 0x3e0   : > { %v1523_v34 = vpack.c.bf16 %v1495_v25, %v1493_v28 }
 0x3e2   : > { %1748 = vmatmul.bf16.gmra.mxu2 %v1523_v34  ;;  %1846 = vmatmul.bf16.gmra.mxu0 %v1523_v34 }
 0x3e3   : > { %v1456_v49 = vpop.f32.mrf.mxu1 }
 0x3e4   : > { %v1496_v55 = vmax.f32 %v1456_v49, 0.0  ;;  %v1569_v49 = vld [vmem:[%s4394_s7] sm:$0x3] }
 0x3e5   : > { %v1410_v4 = vpop.f32.mrf.mxu0 }
 0x3e6   : > { %v1524_v60 = vpack.c.bf16 %v1496_v55, %v1494_v50  ;;  %v1497_v42 = vmax.f32 %v1410_v4, 0.0  ;;  %v4167_v55 = vperm.slane %v1569_v49, 1 }
 0x3e8   : > { %1797 = vmatmul.bf16.gmra.mxu3 %v1524_v60  ;;  %1895 = vmatmul.bf16.gmra.mxu1 %v1524_v60 }
 0x3eb   : > { %v1459_v12 = vpop.f32.mrf.mxu1 }
 0x3ec   : > { %v1498_v29 = vmax.f32 %v1459_v12, 0.0 }
 0x3ed   : > { %v1412_v36 = vpop.f32.mrf.mxu0 }
 0x3ee   : > { %v1499_v13 = vmax.f32 %v1412_v36, 0.0  ;;  %v4170_v36 = vperm.slane %v1569_v49, 0 }
 0x3f0   : > { %v1525_v30 = vpack.c.bf16 %v1499_v13, %v1497_v42 }
 0x3f2   : > { %1753 = vmatmul.bf16.gmra.mxu2 %v1525_v30  ;;  %1851 = vmatmul.bf16.gmra.mxu0 %v1525_v30 }
 0x3f3   : > { %v1461_v37 = vpop.f32.mrf.mxu1 }
 0x3f4   : > { %v1500_v51 = vmax.f32 %v1461_v37, 0.0 }
 0x3f5   : > { %v1415_v8 = vpop.f32.mrf.mxu0 }
 0x3f6   : > { %v1526_v14 = vpack.c.bf16 %v1500_v51, %v1498_v29  ;;  %v1501_v21 = vmax.f32 %v1415_v8, 0.0 }
 0x3f8   : > { %1802 = vmatmul.bf16.gmra.mxu3 %v1526_v14  ;;  %1900 = vmatmul.bf16.gmra.mxu1 %v1526_v14 }
 0x3fb   : > { %v1464_v0 = vpop.f32.mrf.mxu1 }
 0x3fc   : > { %v1502_v5 = vmax.f32 %v1464_v0, 0.0 }
 0x3fd   : > { %v1417_v1 = vpop.f32.mrf.mxu0 }
 0x3fe   : > { %v1503_v24 = vmax.f32 %v1417_v1, 0.0 }
 0x400   : > { %v1527_v26 = vpack.c.bf16 %v1503_v24, %v1501_v21 }
 0x402   : > { %1758 = vmatmul.bf16.gmra.mxu2 %v1527_v26  ;;  %1856 = vmatmul.bf16.gmra.mxu0 %v1527_v26 }
 0x403   : > { %v1466_v11 = vpop.f32.mrf.mxu1 }
 0x404   : > { %v1504_v23 = vmax.f32 %v1466_v11, 0.0 }
 0x405   : > { %v1420_v54 = vpop.f32.mrf.mxu0 }
 0x406   : > { %v1528_v62 = vpack.c.bf16 %v1504_v23, %v1502_v5  ;;  %v1505_v2 = vmax.f32 %v1420_v54, 0.0 }
 0x408   : > { %1807 = vmatmul.bf16.gmra.mxu3 %v1528_v62  ;;  %1905 = vmatmul.bf16.gmra.mxu1 %v1528_v62 }
 0x40b   : > { %v1469_v44 = vpop.f32.mrf.mxu1 }
 0x40c   : > { %v1506_v16 = vmax.f32 %v1469_v44, 0.0 }
 0x40d   : > { %v1422_v45 = vpop.f32.mrf.mxu0 }
 0x40e   : > { %v1507_v20 = vmax.f32 %v1422_v45, 0.0 }
 0x410   : > { %v1529_v19 = vpack.c.bf16 %v1507_v20, %v1505_v2 }
 0x412   : > { %1763 = vmatmul.bf16.gmra.mxu2 %v1529_v19  ;;  %1861 = vmatmul.bf16.gmra.mxu0 %v1529_v19 }
 0x413   : > { %v1471_v59 = vpop.f32.mrf.mxu1 }
 0x414   : > { %v1508_v39 = vmax.f32 %v1471_v59, 0.0 }
 0x415   : > { %v1425_v9 = vpop.f32.mrf.mxu0 }
 0x416   : > { %v1530_v61 = vpack.c.bf16 %v1508_v39, %v1506_v16  ;;  %v1509_v57 = vmax.f32 %v1425_v9, 0.0 }
 0x418   : > { %1812 = vmatmul.bf16.gmra.mxu3 %v1530_v61  ;;  %1910 = vmatmul.bf16.gmra.mxu1 %v1530_v61 }
 0x41b   : > { %v1474_v35 = vpop.f32.mrf.mxu1 }
 0x41c   : > { %v1510_v48 = vmax.f32 %v1474_v35, 0.0 }
 0x41d   : > { %v1427_v27 = vpop.f32.mrf.mxu0 }
 0x41e   : > { %v1511_v46 = vmax.f32 %v1427_v27, 0.0 }
 0x420   : > { %v1531_v56 = vpack.c.bf16 %v1511_v46, %v1509_v57 }
 0x422   : > { %1768 = vmatmul.bf16.gmra.mxu2 %v1531_v56  ;;  %1866 = vmatmul.bf16.gmra.mxu0 %v1531_v56 }
 0x423   : > { %v1476_v58 = vpop.f32.mrf.mxu1 }
 0x424   : > { %v1512_v38 = vmax.f32 %v1476_v58, 0.0 }
 0x425   : > { %v1430_v40 = vpop.f32.mrf.mxu0 }
 0x426   : > { %v1532_v52 = vpack.c.bf16 %v1512_v38, %v1510_v48  ;;  %v1513_v41 = vmax.f32 %v1430_v40, 0.0 }
 0x428   : > { %1817 = vmatmul.bf16.gmra.mxu3 %v1532_v52  ;;  %1915 = vmatmul.bf16.gmra.mxu1 %v1532_v52 }
 0x42b   : > { %v1479_v63 = vpop.f32.mrf.mxu1 }
 0x42c   : > { %v1514_v15 = vmax.f32 %v1479_v63, 0.0 }
 0x42d   : > { %v1432_v31 = vpop.f32.mrf.mxu0 }
 0x42e   : > { %v1515_v32 = vmax.f32 %v1432_v31, 0.0 }
 0x430   : > { %v1533_v53 = vpack.c.bf16 %v1515_v32, %v1513_v41 }
 0x432   : > { %1773 = vmatmul.bf16.gmra.mxu2 %v1533_v53  ;;  %1871 = vmatmul.bf16.gmra.mxu0 %v1533_v53 }
 0x433   : > { %v1481_v10 = vpop.f32.mrf.mxu1 }
 0x434   : > { %v1516_v22 = vmax.f32 %v1481_v10, 0.0 }
 0x435   : > { %v1435_v43 = vpop.f32.mrf.mxu0 }
 0x436   : > { %v1534_v17 = vpack.c.bf16 %v1516_v22, %v1514_v15  ;;  %v1517_v6 = vmax.f32 %v1435_v43, 0.0 }
 0x438   : > { %1822 = vmatmul.bf16.gmra.mxu3 %v1534_v17  ;;  %1920 = vmatmul.bf16.gmra.mxu1 %v1534_v17 }
 0x43b   : > { %v1484_v33 = vpop.f32.mrf.mxu1 }
 0x43c   : > { %v1518_v28 = vmax.f32 %v1484_v33, 0.0 }
 0x43d   : > { %v1437_v47 = vpop.f32.mrf.mxu0 }
 0x43e   : > { %v1519_v3 = vmax.f32 %v1437_v47, 0.0 }
 0x440   : > { %v1535_v7 = vpack.c.bf16 %v1519_v3, %v1517_v6 }
 0x442   : > { %1778 = vmatmul.bf16.gmra.mxu2 %v1535_v7  ;;  %1876 = vmatmul.bf16.gmra.mxu0 %v1535_v7 }
 0x443   : > { %v1486_v18 = vpop.f32.mrf.mxu1 }
 0x444   : > { %v1520_v25 = vmax.f32 %v1486_v18, 0.0 }
 0x446   : > { %v1536_v34 = vpack.c.bf16 %v1520_v25, %v1518_v28 }
 0x448   : > { %1827 = vmatmul.bf16.gmra.mxu3 %v1536_v34  ;;  %1925 = vmatmul.bf16.gmra.mxu1 %v1536_v34 }
 0x44f   : > { %v1842_v50 = vpop.f32.mrf.mxu0 }
 0x450   : > { %v1843_v4 = vadd.f32 %v1842_v50, %v4167_v55 }
 0x455   : > { %v1744_v60 = vpop.f32.mrf.mxu2  ;;  %v1891_v12 = vpop.f32.mrf.mxu1 }
 0x456   : > { %v4172_v42 = vadd.f32 %v1891_v12, %v1843_v4  ;;  %v1745_v30 = vadd.f32 %v1744_v60, %v4170_v36 }
 0x457   : > { %v4174_v13 = vpop.f32.mrf.mxu0 }
 0x458   : > { %4462 = vst [vmem:[#allocation33_spill] sm:$0xff] %v4172_v42 }
 0x45b   : > { %v1793_v37 = vpop.f32.mrf.mxu3 }
 0x45c   : > { %v4177_v29 = vadd.f32 %v1793_v37, %v1745_v30 }
 0x45d   : > { %v4179_v51 = vpop.f32.mrf.mxu2  ;;  %v4181_v8 = vpop.f32.mrf.mxu1 }
 0x45e   : > { %4463 = vst [vmem:[#allocation34_spill] sm:$0xff] %v4177_v29 }
 0x45f   : > { %v1847_v14 = vpop.f32.mrf.mxu0 }
 0x460   : > { %v1848_v1 = vadd.f32 %v1847_v14, %v4167_v55 }
 0x463   : > { %v4183_v0 = vpop.f32.mrf.mxu3 }
 0x464   : > { %4464 = vst [vmem:[#allocation24_spill] sm:$0xff] %v4183_v0 }
 0x465   : > { %v1749_v21 = vpop.f32.mrf.mxu2  ;;  %v1896_v24 = vpop.f32.mrf.mxu1 }
 0x466   : > { %v4186_v26 = vadd.f32 %v1896_v24, %v1848_v1  ;;  %v1750_v5 = vadd.f32 %v1749_v21, %v4170_v36 }
 0x467   : > { %v4188_v11 = vpop.f32.mrf.mxu0 }
 0x46b   : > { %v1798_v23 = vpop.f32.mrf.mxu3 }
 0x46c   : > { %v4191_v54 = vadd.f32 %v1798_v23, %v1750_v5 }
 0x46d   : > { %v4193_v62 = vpop.f32.mrf.mxu2  ;;  %v4195_v44 = vpop.f32.mrf.mxu1 }
 0x46e   : > { %4465 = vst [vmem:[#allocation32_spill] sm:$0xff] %v4191_v54 }
 0x46f   : > { %v1852_v45 = vpop.f32.mrf.mxu0 }
 0x470   : > { %v1853_v20 = vadd.f32 %v1852_v45, %v4167_v55 }
 0x473   : > { %v4197_v2 = vpop.f32.mrf.mxu3 }
 0x475   : > { %v1754_v19 = vpop.f32.mrf.mxu2  ;;  %v1901_v59 = vpop.f32.mrf.mxu1 }
 0x476   : > { %v4200_v16 = vadd.f32 %v1901_v59, %v1853_v20  ;;  %v1755_v9 = vadd.f32 %v1754_v19, %v4170_v36 }
 0x477   : > { %v4202_v39 = vpop.f32.mrf.mxu0 }
 0x47b   : > { %v1803_v61 = vpop.f32.mrf.mxu3 }
 0x47c   : > { %v4205_v35 = vadd.f32 %v1803_v61, %v1755_v9 }
 0x47d   : > { %v4207_v27 = vpop.f32.mrf.mxu2  ;;  %v4209_v57 = vpop.f32.mrf.mxu1 }
 0x47f   : > { %v1857_v46 = vpop.f32.mrf.mxu0 }
 0x480   : > { %v1858_v58 = vadd.f32 %v1857_v46, %v4167_v55 }
 0x483   : > { %v4211_v56 = vpop.f32.mrf.mxu3 }
 0x485   : > { %v1759_v48 = vpop.f32.mrf.mxu2  ;;  %v1906_v38 = vpop.f32.mrf.mxu1 }
 0x486   : > { %v4214_v40 = vadd.f32 %v1906_v38, %v1858_v58  ;;  %v1760_v63 = vadd.f32 %v1759_v48, %v4170_v36 }
 0x487   : > { %v4216_v52 = vpop.f32.mrf.mxu0 }
 0x48b   : > { %v1808_v31 = vpop.f32.mrf.mxu3 }
 0x48c   : > { %v4219_v41 = vadd.f32 %v1808_v31, %v1760_v63 }
 0x48d   : > { %v4221_v32 = vpop.f32.mrf.mxu2  ;;  %v4223_v53 = vpop.f32.mrf.mxu1 }
 0x48f   : > { %v1862_v10 = vpop.f32.mrf.mxu0 }
 0x490   : > { %v1863_v22 = vadd.f32 %v1862_v10, %v4167_v55 }
 0x493   : > { %v4225_v15 = vpop.f32.mrf.mxu3 }
 0x495   : > { %v1764_v43 = vpop.f32.mrf.mxu2  ;;  %v1911_v17 = vpop.f32.mrf.mxu1 }
 0x496   : > { %v4228_v33 = vadd.f32 %v1911_v17, %v1863_v22  ;;  %v1765_v6 = vadd.f32 %v1764_v43, %v4170_v36 }
 0x497   : > { %v1864_v47 = vpop.f32.mrf.mxu0 }
 0x49b   : > { %v1813_v3 = vpop.f32.mrf.mxu3 }
 0x49c   : > { %v4231_v7 = vadd.f32 %v1813_v3, %v1765_v6 }
 0x49d   : > { %v4233_v18 = vpop.f32.mrf.mxu2  ;;  %v1913_v28 = vpop.f32.mrf.mxu1 }
 0x49f   : > { %v1867_v25 = vpop.f32.mrf.mxu0 }
 0x4a3   : > { %v4235_v34 = vpop.f32.mrf.mxu3 }
 0x4a5   : > { %v1769_v49 = vpop.f32.mrf.mxu2  ;;  %v1916_v50 = vpop.f32.mrf.mxu1 }
 0x4a7   : > { %v1869_v4 = vpop.f32.mrf.mxu0 }
 0x4a8   : > { %v1870_v3 = vadd.f32 %v1869_v4, %v4167_v55 }
 0x4ab   : > { %v1818_v60 = vpop.f32.mrf.mxu3 }
 0x4ad   : > { %v1771_v12 = vpop.f32.mrf.mxu2  ;;  %v1918_v30 = vpop.f32.mrf.mxu1 }
 0x4af   : > { %v1872_v37 = vpop.f32.mrf.mxu0 }
 0x4b0   : > { %v1873_v43 = vadd.f32 %v1872_v37, %v4167_v55  ;;  %v1865_v37 = vadd.f32 %v1864_v47, %v4167_v55  ;;  %v1767_v47 = vadd.f32 %v4233_v18, %v4170_v36 }
 0x4b3   : > { %v1820_v14 = vpop.f32.mrf.mxu3 }
 0x4b5   : > { %v1774_v1 = vpop.f32.mrf.mxu2  ;;  %v1921_v21 = vpop.f32.mrf.mxu1 }
 0x4b6   : > { %v1922_v29 = vadd.f32 %v1921_v21, %v1873_v43  ;;  %v1775_v4 = vadd.f32 %v1774_v1, %v4170_v36  ;;  %v1816_v1 = vadd.f32 %v4235_v34, %v1767_v47  ;;  %v1757_v34 = vadd.f32 %v4207_v27, %v4170_v36  ;;  %v3118_v47 = vld [vmem:[#allocation11 + $0x50] sm:$0xf] }
 0x4b7   : > { %v1874_v24 = vpop.f32.mrf.mxu0 }
 0x4b8   : > { %v1875_v63 = vadd.f32 %v1874_v24, %v4167_v55 }
 0x4bb   : > { %v1823_v5 = vpop.f32.mrf.mxu3 }
 0x4bd   : > { %v1776_v23 = vpop.f32.mrf.mxu2  ;;  %v1923_v45 = vpop.f32.mrf.mxu1 }
 0x4be   : > { %v1924_v17 = vadd.f32 %v1923_v45, %v1875_v63  ;;  %v1777_v24 = vadd.f32 %v1776_v23, %v4170_v36  ;;  %v1772_v63 = vadd.f32 %v1771_v12, %v4170_v36  ;;  %v1855_v12 = vadd.f32 %v4202_v39, %v4167_v55 }
 0x4bf   : > { %v1877_v20 = vpop.f32.mrf.mxu0 }
 0x4c0   : > { %v1878_v58 = vadd.f32 %v1877_v20, %v4167_v55  ;;  %v1868_v20 = vadd.f32 %v1867_v25, %v4167_v55  ;;  %v1824_v25 = vadd.f32 %v1823_v5, %v1775_v4  ;;  %v3322_v4 = vld [vmem:[#allocation11 + $0x64] sm:$0xf0] }
 0x4c2   : > { %v1917_v45 = vadd.f32 %v1916_v50, %v1868_v20 }
 0x4c3   : > { %v1825_v19 = vpop.f32.mrf.mxu3 }
 0x4c4   : > { %v1826_v21 = vadd.f32 %v1825_v19, %v1777_v24  ;;  %v3321_v24 = vld [vmem:[#allocation11 + $0x64] sm:$0xf] }
 0x4c5   : > { %v1779_v59 = vpop.f32.mrf.mxu2  ;;  %v1926_v9 = vpop.f32.mrf.mxu1 }
 0x4c6   : > { %v1927_v31 = vadd.f32 %v1926_v9, %v1878_v58  ;;  %v1780_v54 = vadd.f32 %v1779_v59, %v4170_v36  ;;  %v1944_v9 = vpack.c.bf16 %v1924_v17, %v1922_v29  ;;  %v1914_v59 = vadd.f32 %v1913_v28, %v1865_v37  ;;  %v3192_v37 = vld [vmem:[#allocation11 + $0xe8] sm:$0xf0] }
 0x4c7   : > { %v1879_v61 = vpop.f32.mrf.mxu0  ;;  %v1770_v29 = vadd.f32 %v1769_v49, %v4170_v36  ;;  %v1904_v49 = vadd.f32 %v4209_v57, %v1855_v12 }
 0x4c8   : > { %v1880_v48 = vadd.f32 %v1879_v61, %v4167_v55  ;;  %v1919_v61 = vadd.f32 %v1918_v30, %v1870_v3  ;;  %v1860_v30 = vadd.f32 %v4216_v52, %v4167_v55  ;;  %v1940_v28 = vpack.c.bf16 %v1914_v59, %v4228_v33  ;;  %v3340_v3 = vld [vmem:[#allocation11 + $0xf4] sm:$0xf0]  ;;  %v3190_v59 = vld [vmem:[#allocation11 + $0xe0] sm:$0xf] }
 0x4c9   : > { %v1819_v50 = vadd.f32 %v1818_v60, %v1770_v29  ;;  %v1850_v33 = vadd.f32 %v4188_v11, %v4167_v55  ;;  %v1939_v60 = vpack.c.bf16 %v1816_v1, %v4231_v7  ;;  %v1936_v57 = vpack.c.bf16 %v1904_v49, %v4200_v16  ;;  %v3120_v29 = vld [vmem:[#allocation11 + $0x58] sm:$0xf0]  ;;  %v3182_v1 = vld [vmem:[#allocation11 + $0xd0] sm:$0xf] }
 0x4cb   : > { %v1828_v46 = vpop.f32.mrf.mxu3  ;;  %v1899_v39 = vadd.f32 %v4195_v44, %v1850_v33  ;;  %v1752_v44 = vadd.f32 %v4193_v62, %v4170_v36  ;;  %v3441_v62 = vld [vmem:[%s3929_s20] sm:$0xff]  ;;  %v3112_v33 = vld [vmem:[#allocation11 + $0x48] sm:$0xf0] }
 0x4cc   : > { %v1829_v58 = vadd.f32 %v1828_v46, %v1780_v54  ;;  %v1909_v54 = vadd.f32 %v4223_v53, %v1860_v30  ;;  %v3339_v46 = vld [vmem:[#allocation11 + $0xf4] sm:$0xf] }
 0x4cd   : > { %v1928_v38 = vpop.f32.mrf.mxu1  ;;  %v1781_v22 = vpop.f32.mrf.mxu2  ;;  %v1934_v7 = vpack.c.bf16 %v1899_v39, %v4186_v26  ;;  %v1801_v16 = vadd.f32 %v4197_v2, %v1752_v44  ;;  %v4469_v26 = vld [vmem:[#allocation34_spill] sm:$0xff]  ;;  %v3176_v39 = vld [vmem:[#allocation11 + $0xc8] sm:$0xf0] }
 0x4ce   : > { %v1929_v10 = vadd.f32 %v1928_v38, %v1880_v48  ;;  %v1782_v0 = vadd.f32 %v1781_v22, %v4170_v36  ;;  %v1938_v53 = vpack.c.bf16 %v1909_v54, %v4214_v40  ;;  %v1845_v40 = vadd.f32 %v4174_v13, %v4167_v55  ;;  %v4466_v13 = vld [vmem:[#allocation33_spill] sm:$0xff]  ;;  %v3323_v2 = vld [vmem:[#allocation11 + $0x74] sm:$0xf]  ;;  %v3324_v22 = vld [vmem:[#allocation11 + $0x74] sm:$0xf0] }
 0x4cf   : > { %v1747_v55 = vadd.f32 %v4179_v51, %v4170_v36  ;;  %v3200_v51 = vld [vmem:[#allocation11 + $0xf8] sm:$0xf0]  ;;  %v3319_v30 = vld [vmem:[#allocation11 + $0x54] sm:$0xf] }
 0x4d0   : > { %v1946_v6 = vpack.c.bf16 %v1929_v10, %v1927_v31  ;;  %v1942_v31 = vpack.c.bf16 %v1919_v61, %v1917_v45  ;;  %v3134_v10 = vld [vmem:[#allocation11 + $0x70] sm:$0xf]  ;;  %v3203_v43 = vor.u32 %v3339_v46, %v3200_v51  ;;  %v3442_v61 = vld [vmem:[%s3929_s20 + $0x8] sm:$0xff]  ;;  %v3126_v45 = vld [vmem:[#allocation11 + $0x60] sm:$0xf] }
 0x4d1   : > { %v3135_v17 = vor.u32 %v3324_v22, %v3134_v10  ;;  %v3184_v54 = vld [vmem:[#allocation11 + $0xd8] sm:$0xf0]  ;;  %v3096_v46 = vld [vmem:[#allocation11 + $0x28] sm:$0xf0]  ;;  %v3094_v22 = vld [vmem:[#allocation11 + $0x20] sm:$0xf] }
 0x4d2   : > { %1996 = vmatpush.bf16.msrb.mxu3 %v1946_v6  ;;  %v3198_v6 = vld [vmem:[#allocation11 + $0xf0] sm:$0xf]  ;;  %v3160_v10 = vld [vmem:[#allocation11 + $0xa8] sm:$0xf0] }
 0x4d3   : > { %v1830_v42 = vpop.f32.mrf.mxu3  ;;  %v3199_v20 = vor.u32 %v3340_v3, %v3198_v6  ;;  %2291 = vmatpush.bf16.msra.mxu0 %v3135_v17  ;;  %v3158_v3 = vld [vmem:[#allocation11 + $0xa0] sm:$0xf] }
 0x4d4   : > { %v1831_v48 = vadd.f32 %v1830_v42, %v1782_v0  ;;  %v1821_v42 = vadd.f32 %v1820_v14, %v1772_v63  ;;  %v1943_v0 = vpack.c.bf16 %v1826_v21, %v1824_v25  ;;  %v1762_v14 = vadd.f32 %v4221_v32, %v4170_v36  ;;  %v3338_v63 = vld [vmem:[#allocation11 + $0xe4] sm:$0xf0]  ;;  %v3443_v25 = vld [vmem:[%s3929_s20 + $0x10] sm:$0xff] }
 0x4d5   : > { %v1806_v32 = vadd.f32 %v4211_v56, %v1757_v34  ;;  %2340 = vmatpush.bf16.msra.mxu1 %v3199_v20  ;;  %v3110_v34 = vld [vmem:[#allocation11 + $0x40] sm:$0xf]  ;;  %v3330_v20 = vld [vmem:[#allocation11 + $0xa4] sm:$0xf0] }
 0x4d6   : > { %v1945_v38 = vpack.c.bf16 %v1831_v48, %v1829_v58  ;;  %1997 = vmatpush.bf16.msrb.mxu3 %v1944_v9  ;;  %v1941_v52 = vpack.c.bf16 %v1821_v42, %v1819_v50  ;;  %v1811_v18 = vadd.f32 %v4225_v15, %v1762_v14  ;;  %v1894_v15 = vadd.f32 %v4181_v8, %v1845_v40  ;;  %v4468_v8 = vld [vmem:[#allocation32_spill] sm:$0xff]  ;;  %v3128_v9 = vld [vmem:[#allocation11 + $0x68] sm:$0xf0]  ;;  %v3335_v42 = vld [vmem:[#allocation11 + $0xd4] sm:$0xf] }
 0x4d7   : > { %v1935_v27 = vpack.c.bf16 %v1806_v32, %v4205_v35  ;;  %v1933_v23 = vpack.c.bf16 %v1801_v16, %v4468_v8  ;;  %v3136_v35 = vld [vmem:[#allocation11 + $0x78] sm:$0xf0]  ;;  %v3337_v58 = vld [vmem:[#allocation11 + $0xe4] sm:$0xf]  ;;  %v3131_v48 = vor.u32 %v3321_v24, %v3128_v9  ;;  %v3187_v50 = vor.u32 %v3335_v42, %v3184_v54  ;;  %v3315_v16 = vld [vmem:[#allocation11 + $0x34] sm:$0xf] }
 0x4d8   : > { %1947 = vmatpush.bf16.msrb.mxu2 %v1945_v38  ;;  %v1937_v11 = vpack.c.bf16 %v1811_v18, %v4219_v41  ;;  %v1932_v56 = vpack.c.bf16 %v1894_v15, %v4466_v13  ;;  %v4467_v41 = vld [vmem:[#allocation24_spill] sm:$0xff]  ;;  %v3139_v36 = vor.u32 %v3323_v2, %v3136_v35  ;;  %v3195_v21 = vor.u32 %v3337_v58, %v3192_v37  ;;  %v3444_v14 = vld [vmem:[%s3929_s20 + $0x18] sm:$0xff]  ;;  %v3334_v15 = vld [vmem:[#allocation11 + $0xc4] sm:$0xf0] }
 0x4d9   : > { %v1796_v5 = vadd.f32 %v4467_v41, %v1747_v55  ;;  %v3127_v38 = vor.u32 %v3322_v4, %v3126_v45  ;;  %v3333_v18 = vld [vmem:[#allocation11 + $0xc4] sm:$0xf]  ;;  %v3331_v55 = vld [vmem:[#allocation11 + $0xb4] sm:$0xf]  ;;  %v3102_v41 = vld [vmem:[#allocation11 + $0x30] sm:$0xf] }
 0x4da   : > { %1998 = vmatpush.bf16.msrb.mxu3 %v1942_v31  ;;  %v3191_v31 = vor.u32 %v3338_v63, %v3190_v59  ;;  %v3179_v40 = vor.u32 %v3333_v18, %v3176_v39  ;;  %v3446_v2 = vld [vmem:[%s3929_s20 + $0x28] sm:$0xff]  ;;  %v3313_v35 = vld [vmem:[#allocation11 + $0x24] sm:$0xf]  ;;  %v3447_v24 = vld [vmem:[%s3929_s20 + $0x30] sm:$0xff] }
 0x4db   : > { %v1931_v19 = vpack.c.bf16 %v1796_v5, %v4469_v26  ;;  %2292 = vmatpush.bf16.msra.mxu0 %v3127_v38  ;;  %v3316_v5 = vld [vmem:[#allocation11 + $0x34] sm:$0xf0]  ;;  %v3099_v51 = vor.u32 %v3313_v35, %v3096_v46  ;;  %v3327_v9 = vld [vmem:[#allocation11 + $0x94] sm:$0xf]  ;;  %v3152_v58 = vld [vmem:[#allocation11 + $0x98] sm:$0xf0] }
 0x4dc   : > { %1948 = vmatpush.bf16.msrb.mxu2 %v1943_v0  ;;  %2341 = vmatpush.bf16.msra.mxu1 %v3191_v31  ;;  %v3123_v0 = vor.u32 %v3319_v30, %v3120_v29  ;;  %v3332_v26 = vld [vmem:[#allocation11 + $0xb4] sm:$0xf0]  ;;  %v3155_v37 = vor.u32 %v3327_v9, %v3152_v58  ;;  %v3088_v38 = vld [vmem:[#allocation11 + $0x18] sm:$0xf0]  ;;  %v3325_v63 = vld [vmem:[#allocation11 + $0x84] sm:$0xf] }
 0x4dd   : > { %v3328_v45 = vld [vmem:[#allocation11 + $0x94] sm:$0xf0]  ;;  %v3144_v31 = vld [vmem:[#allocation11 + $0x88] sm:$0xf0]  ;;  %v3326_v29 = vld [vmem:[#allocation11 + $0x84] sm:$0xf0] }
 0x4de   : > { %1999 = vmatpush.bf16.msrb.mxu3 %v1940_v28  ;;  %v3320_v28 = vld [vmem:[#allocation11 + $0x54] sm:$0xf0]  ;;  %v3147_v30 = vor.u32 %v3325_v63, %v3144_v31  ;;  %v3086_v42 = vld [vmem:[#allocation11 + $0x10] sm:$0xf] }
 0x4df   : > { %v3119_v12 = vor.u32 %v3320_v28, %v3118_v47  ;;  %v3448_v28 = vld [vmem:[%s3929_s20 + $0x38] sm:$0xff] }
 0x4e0   : > { %1949 = vmatpush.bf16.msrb.mxu2 %v1941_v52  ;;  %v3336_v52 = vld [vmem:[#allocation11 + $0xd4] sm:$0xf0] }
 0x4e1   : > { %v3183_v49 = vor.u32 %v3336_v52, %v3182_v1  ;;  %2293 = vmatpush.bf16.msra.mxu0 %v3119_v12  ;;  %v3080_v12 = vld [vmem:[#allocation11 + $0x8] sm:$0xf0]  ;;  %v3078_v1 = vld [vmem:[#allocation11] sm:$0xf] }
 0x4e2   : > { %2000 = vmatpush.bf16.msrb.mxu3 %v1938_v53  ;;  %v3317_v53 = vld [vmem:[#allocation11 + $0x44] sm:$0xf] }
 0x4e3   : > { %2342 = vmatpush.bf16.msra.mxu1 %v3183_v49  ;;  %v3310_v49 = vld [vmem:[#allocation11 + $0x4] sm:$0xf0] }
 0x4e4   : > { %1950 = vmatpush.bf16.msrb.mxu2 %v1939_v60  ;;  %v3115_v60 = vor.u32 %v3317_v53, %v3112_v33 }
 0x4e6   : > { %2001 = vmatpush.bf16.msrb.mxu3 %v1936_v57  ;;  %v3318_v57 = vld [vmem:[#allocation11 + $0x44] sm:$0xf0] }
 0x4e7   : > { %v3111_v32 = vor.u32 %v3318_v57, %v3110_v34 }
 0x4e8   : > { %1951 = vmatpush.bf16.msrb.mxu2 %v1937_v11  ;;  %v3174_v11 = vld [vmem:[#allocation11 + $0xc0] sm:$0xf] }
 0x4e9   : > { %v3175_v44 = vor.u32 %v3334_v15, %v3174_v11  ;;  %2294 = vmatpush.bf16.msra.mxu0 %v3111_v32 }
 0x4ea   : > { %2002 = vmatpush.bf16.msrb.mxu3 %v1934_v7  ;;  %v3445_v7 = vld [vmem:[%s3929_s20 + $0x20] sm:$0xff] }
 0x4eb   : > { %2343 = vmatpush.bf16.msra.mxu1 %v3175_v44 }
 0x4ec   : > { %1952 = vmatpush.bf16.msrb.mxu2 %v1935_v27  ;;  %v3104_v27 = vld [vmem:[#allocation11 + $0x38] sm:$0xf0] }
 0x4ed   : > { %v3107_v13 = vor.u32 %v3315_v16, %v3104_v27 }
 0x4ee   : > { %2003 = vmatpush.bf16.msrb.mxu3 %v1932_v56  ;;  %v3168_v56 = vld [vmem:[#allocation11 + $0xb8] sm:$0xf0] }
 0x4ef   : > { %v3171_v8 = vor.u32 %v3331_v55, %v3168_v56 }
 0x4f0   : > { %1953 = vmatpush.bf16.msrb.mxu2 %v1933_v23  ;;  %v3103_v23 = vor.u32 %v3316_v5, %v3102_v41 }
 0x4f1   : > { %2004 = vmatmul.bf16.vlgmr.msrb.gmra.mxu3 %v3441_v62 }
 0x4f2   : > { %2438 = vmatpush.bf16.msra.mxu3 %v3203_v43  ;;  %2295 = vmatpush.bf16.msra.mxu0 %v3103_v23  ;;  %v3314_v43 = vld [vmem:[#allocation11 + $0x24] sm:$0xf0] }
 0x4f3   : > { %v3095_v6 = vor.u32 %v3314_v43, %v3094_v22 }
 0x4f4   : > { %1954 = vmatpush.bf16.msrb.mxu2 %v1931_v19 }
 0x4f6   : > { %2439 = vmatpush.bf16.msra.mxu3 %v3195_v21  ;;  %2296 = vmatpush.bf16.msra.mxu0 %v3095_v6  ;;  %v3311_v21 = vld [vmem:[#allocation11 + $0x14] sm:$0xf] }
 0x4f7   : > { %1955 = vmatmul.bf16.vlgmr.msrb.gmra.mxu2 %v3441_v62  ;;  %v3166_v62 = vld [vmem:[#allocation11 + $0xb0] sm:$0xf]  ;;  %v3091_v59 = vor.u32 %v3311_v21, %v3088_v38 }
 0x4f8   : > { %2389 = vmatpush.bf16.msra.mxu2 %v3139_v36  ;;  %v3167_v19 = vor.u32 %v3332_v26, %v3166_v62  ;;  %v3329_v36 = vld [vmem:[#allocation11 + $0xa4] sm:$0xf] }
 0x4f9   : > { %v3163_v17 = vor.u32 %v3329_v36, %v3160_v10 }
 0x4fa   : > { %2440 = vmatpush.bf16.msra.mxu3 %v3187_v50  ;;  %2344 = vmatpush.bf16.msra.mxu1 %v3167_v19  ;;  %v3309_v50 = vld [vmem:[#allocation11 + $0x4] sm:$0xf] }
 0x4fb   : > { %v3083_v52 = vor.u32 %v3309_v50, %v3080_v12 }
 0x4fc   : > { %2390 = vmatpush.bf16.msra.mxu2 %v3131_v48  ;;  %v3150_v48 = vld [vmem:[#allocation11 + $0x90] sm:$0xf] }
 0x4fd   : > { %v3151_v4 = vor.u32 %v3328_v45, %v3150_v48 }
 0x4fe   : > { %2441 = vmatpush.bf16.msra.mxu3 %v3179_v40 }
 0x500   : > { %2391 = vmatpush.bf16.msra.mxu2 %v3123_v0  ;;  %v3312_v0 = vld [vmem:[#allocation11 + $0x14] sm:$0xf0] }
 0x501   : > { %2009 = vmatmul.bf16.gmra.mxu3 %v3442_v61  ;;  %v3087_v47 = vor.u32 %v3312_v0, %v3086_v42 }
 0x502   : > { %2442 = vmatpush.bf16.msra.mxu3 %v3171_v8 }
 0x503   : > { %2297 = vmatpush.bf16.msra.mxu0 %v3087_v47 }
 0x504   : > { %2392 = vmatpush.bf16.msra.mxu2 %v3115_v60 }
 0x506   : > { %2443 = vmatpush.bf16.msra.mxu3 %v3163_v17 }
 0x507   : > { %1960 = vmatmul.bf16.gmra.mxu2 %v3442_v61  ;;  %v3159_v61 = vor.u32 %v3330_v20, %v3158_v3 }
 0x508   : > { %2393 = vmatpush.bf16.msra.mxu2 %v3107_v13 }
 0x509   : > { %2345 = vmatpush.bf16.msra.mxu1 %v3159_v61 }
 0x50a   : > { %2444 = vmatpush.bf16.msra.mxu3 %v3155_v37 }
 0x50c   : > { %2394 = vmatpush.bf16.msra.mxu2 %v3099_v51 }
 0x50d   : > { %2346 = vmatpush.bf16.msra.mxu1 %v3151_v4 }
 0x50e   : > { %2445 = vmatpush.bf16.msra.mxu3 %v3147_v30 }
 0x510   : > { %2395 = vmatpush.bf16.msra.mxu2 %v3091_v59 }
 0x511   : > { %2014 = vmatmul.bf16.gmra.mxu3 %v3443_v25 }
 0x514   : > { %2396 = vmatpush.bf16.msra.mxu2 %v3083_v52 }
 0x517   : > { %1965 = vmatmul.bf16.gmra.mxu2 %v3443_v25  ;;  %v3142_v25 = vld [vmem:[#allocation11 + $0x80] sm:$0xf] }
 0x518   : > { %v3143_v54 = vor.u32 %v3326_v29, %v3142_v25 }
 0x51a   : > { %2347 = vmatpush.bf16.msra.mxu1 %v3143_v54 }
 0x521   : > { %2019 = vmatmul.bf16.gmra.mxu3 %v3444_v14 }
 0x527   : > { %1970 = vmatmul.bf16.gmra.mxu2 %v3444_v14  ;;  %v3079_v14 = vor.u32 %v3310_v49, %v3078_v1 }
 0x529   : > { %2298 = vmatpush.bf16.msra.mxu0 %v3079_v14 }
 0x531   : > { %2024 = vmatmul.bf16.gmra.mxu3 %v3445_v7 }
 0x537   : > { %1975 = vmatmul.bf16.gmra.mxu2 %v3445_v7 }
 0x541   : > { %2029 = vmatmul.bf16.gmra.mxu3 %v3446_v2 }
 0x547   : > { %1980 = vmatmul.bf16.gmra.mxu2 %v3446_v2 }
 0x551   : > { %2034 = vmatmul.bf16.gmra.mxu3 %v3447_v24 }
 0x557   : > { %1985 = vmatmul.bf16.gmra.mxu2 %v3447_v24 }
 0x561   : > { %2039 = vmatmul.bf16.gmra.mxu3 %v3448_v28 }
 0x567   : > { %1990 = vmatmul.bf16.gmra.mxu2 %v3448_v28 }
 0x574   : > { %v2005_v53 = vpop.f32.mrf.mxu3 }
 0x575   : > { %v2046_v18 = vmax.f32 %v2005_v53, 0.0 }
 0x57a   : > { %v1956_v33 = vpop.f32.mrf.mxu2 }
 0x57b   : > { %v2045_v40 = vmax.f32 %v1956_v33, 0.0 }
 0x57c   : > { %v2007_v60 = vpop.f32.mrf.mxu3 }
 0x57d   : > { %v2048_v39 = vmax.f32 %v2007_v60, 0.0 }
 0x57f   : > { %v2078_v34 = vpack.c.bf16 %v2048_v39, %v2046_v18 }
 0x581   : > { %2446 = vmatmul.bf16.vlgmr.msra.gmra.mxu3 %v2078_v34  ;;  %2348 = vmatmul.bf16.vlgmr.msra.gmra.mxu1 %v2078_v34 }
 0x582   : > { %v1958_v57 = vpop.f32.mrf.mxu2 }
 0x583   : > { %v2047_v32 = vmax.f32 %v1958_v57, 0.0 }
 0x584   : > { %v2010_v11 = vpop.f32.mrf.mxu3 }
 0x585   : > { %v2077_v15 = vpack.c.bf16 %v2047_v32, %v2045_v40  ;;  %v2050_v7 = vmax.f32 %v2010_v11, 0.0 }
 0x587   : > { %2397 = vmatmul.bf16.vlgmr.msra.gmra.mxu2 %v2077_v15  ;;  %2299 = vmatmul.bf16.vlgmr.msra.gmra.mxu0 %v2077_v15 }
 0x58a   : > { %v1961_v44 = vpop.f32.mrf.mxu2 }
 0x58b   : > { %v2049_v56 = vmax.f32 %v1961_v44, 0.0 }
 0x58c   : > { %v2012_v16 = vpop.f32.mrf.mxu3 }
 0x58d   : > { %v2052_v27 = vmax.f32 %v2012_v16, 0.0 }
 0x58f   : > { %v2080_v55 = vpack.c.bf16 %v2052_v27, %v2050_v7 }
 0x591   : > { %2451 = vmatmul.bf16.gmra.mxu3 %v2080_v55  ;;  %2353 = vmatmul.bf16.gmra.mxu1 %v2080_v55 }
 0x592   : > { %v1963_v13 = vpop.f32.mrf.mxu2 }
 0x593   : > { %v2051_v41 = vmax.f32 %v1963_v13, 0.0 }
 0x594   : > { %v2015_v5 = vpop.f32.mrf.mxu3 }
 0x595   : > { %v2079_v8 = vpack.c.bf16 %v2051_v41, %v2049_v56  ;;  %v2054_v62 = vmax.f32 %v2015_v5, 0.0  ;;  %v2125_v56 = vld [vmem:[%s4396_s9] sm:$0x3] }
 0x597   : > { %2402 = vmatmul.bf16.gmra.mxu2 %v2079_v8  ;;  %2304 = vmatmul.bf16.gmra.mxu0 %v2079_v8  ;;  %v4298_v8 = vperm.slane %v2125_v56, 0 }
 0x59a   : > { %v1966_v23 = vpop.f32.mrf.mxu2 }
 0x59b   : > { %v2053_v46 = vmax.f32 %v1966_v23, 0.0 }
 0x59c   : > { %v2017_v26 = vpop.f32.mrf.mxu3 }
 0x59d   : > { %v2056_v19 = vmax.f32 %v2017_v26, 0.0 }
 0x59f   : > { %v2082_v2 = vpack.c.bf16 %v2056_v19, %v2054_v62  ;;  %v4300_v62 = vperm.slane %v2125_v56, 1 }
 0x5a1   : > { %2456 = vmatmul.bf16.gmra.mxu3 %v2082_v2  ;;  %2358 = vmatmul.bf16.gmra.mxu1 %v2082_v2 }
 0x5a2   : > { %v1968_v35 = vpop.f32.mrf.mxu2 }
 0x5a3   : > { %v2055_v36 = vmax.f32 %v1968_v35, 0.0 }
 0x5a4   : > { %v2020_v51 = vpop.f32.mrf.mxu3 }
 0x5a5   : > { %v2081_v10 = vpack.c.bf16 %v2055_v36, %v2053_v46  ;;  %v2058_v43 = vmax.f32 %v2020_v51, 0.0 }
 0x5a7   : > { %2407 = vmatmul.bf16.gmra.mxu2 %v2081_v10  ;;  %2309 = vmatmul.bf16.gmra.mxu0 %v2081_v10 }
 0x5aa   : > { %v1971_v22 = vpop.f32.mrf.mxu2 }
 0x5ab   : > { %v2057_v61 = vmax.f32 %v1971_v22, 0.0 }
 0x5ac   : > { %v2022_v17 = vpop.f32.mrf.mxu3 }
 0x5ad   : > { %v2060_v6 = vmax.f32 %v2022_v17, 0.0 }
 0x5af   : > { %v2084_v3 = vpack.c.bf16 %v2060_v6, %v2058_v43 }
 0x5b1   : > { %2461 = vmatmul.bf16.gmra.mxu3 %v2084_v3  ;;  %2363 = vmatmul.bf16.gmra.mxu1 %v2084_v3 }
 0x5b2   : > { %v1973_v20 = vpop.f32.mrf.mxu2 }
 0x5b3   : > { %v2059_v24 = vmax.f32 %v1973_v20, 0.0 }
 0x5b4   : > { %v2025_v9 = vpop.f32.mrf.mxu3 }
 0x5b5   : > { %v2083_v58 = vpack.c.bf16 %v2059_v24, %v2057_v61  ;;  %v2062_v37 = vmax.f32 %v2025_v9, 0.0 }
 0x5b7   : > { %2412 = vmatmul.bf16.gmra.mxu2 %v2083_v58  ;;  %2314 = vmatmul.bf16.gmra.mxu0 %v2083_v58 }
 0x5ba   : > { %v1976_v48 = vpop.f32.mrf.mxu2 }
 0x5bb   : > { %v2061_v59 = vmax.f32 %v1976_v48, 0.0 }
 0x5bc   : > { %v2027_v45 = vpop.f32.mrf.mxu3 }
 0x5bd   : > { %v2064_v4 = vmax.f32 %v2027_v45, 0.0 }
 0x5bf   : > { %v2086_v21 = vpack.c.bf16 %v2064_v4, %v2062_v37 }
 0x5c1   : > { %2466 = vmatmul.bf16.gmra.mxu3 %v2086_v21  ;;  %2368 = vmatmul.bf16.gmra.mxu1 %v2086_v21 }
 0x5c2   : > { %v1978_v38 = vpop.f32.mrf.mxu2 }
 0x5c3   : > { %v2063_v63 = vmax.f32 %v1978_v38, 0.0 }
 0x5c4   : > { %v2030_v31 = vpop.f32.mrf.mxu3 }
 0x5c5   : > { %v2085_v25 = vpack.c.bf16 %v2063_v63, %v2061_v59  ;;  %v2066_v29 = vmax.f32 %v2030_v31, 0.0 }
 0x5c7   : > { %2417 = vmatmul.bf16.gmra.mxu2 %v2085_v25  ;;  %2319 = vmatmul.bf16.gmra.mxu0 %v2085_v25 }
 0x5ca   : > { %v1981_v30 = vpop.f32.mrf.mxu2 }
 0x5cb   : > { %v2065_v28 = vmax.f32 %v1981_v30, 0.0 }
 0x5cc   : > { %v2032_v42 = vpop.f32.mrf.mxu3 }
 0x5cd   : > { %v2068_v0 = vmax.f32 %v2032_v42, 0.0 }
 0x5cf   : > { %v2088_v54 = vpack.c.bf16 %v2068_v0, %v2066_v29 }
 0x5d1   : > { %2471 = vmatmul.bf16.gmra.mxu3 %v2088_v54  ;;  %2373 = vmatmul.bf16.gmra.mxu1 %v2088_v54 }
 0x5d2   : > { %v1983_v47 = vpop.f32.mrf.mxu2 }
 0x5d3   : > { %v2067_v50 = vmax.f32 %v1983_v47, 0.0 }
 0x5d4   : > { %v2035_v12 = vpop.f32.mrf.mxu3 }
 0x5d5   : > { %v2087_v1 = vpack.c.bf16 %v2067_v50, %v2065_v28  ;;  %v2070_v49 = vmax.f32 %v2035_v12, 0.0 }
 0x5d7   : > { %2422 = vmatmul.bf16.gmra.mxu2 %v2087_v1  ;;  %2324 = vmatmul.bf16.gmra.mxu0 %v2087_v1 }
 0x5da   : > { %v1986_v52 = vpop.f32.mrf.mxu2 }
 0x5db   : > { %v2069_v60 = vmax.f32 %v1986_v52, 0.0 }
 0x5dc   : > { %v2037_v14 = vpop.f32.mrf.mxu3 }
 0x5dd   : > { %v2072_v53 = vmax.f32 %v2037_v14, 0.0 }
 0x5df   : > { %v2090_v33 = vpack.c.bf16 %v2072_v53, %v2070_v49 }
 0x5e1   : > { %2476 = vmatmul.bf16.gmra.mxu3 %v2090_v33  ;;  %2378 = vmatmul.bf16.gmra.mxu1 %v2090_v33 }
 0x5e2   : > { %v1988_v18 = vpop.f32.mrf.mxu2 }
 0x5e3   : > { %v2071_v39 = vmax.f32 %v1988_v18, 0.0 }
 0x5e4   : > { %v2040_v34 = vpop.f32.mrf.mxu3 }
 0x5e5   : > { %v2089_v57 = vpack.c.bf16 %v2071_v39, %v2069_v60  ;;  %v2074_v32 = vmax.f32 %v2040_v34, 0.0 }
 0x5e7   : > { %2427 = vmatmul.bf16.gmra.mxu2 %v2089_v57  ;;  %2329 = vmatmul.bf16.gmra.mxu0 %v2089_v57 }
 0x5ea   : > { %v1991_v40 = vpop.f32.mrf.mxu2 }
 0x5eb   : > { %v2073_v16 = vmax.f32 %v1991_v40, 0.0 }
 0x5ec   : > { %v2042_v11 = vpop.f32.mrf.mxu3 }
 0x5ed   : > { %v2076_v15 = vmax.f32 %v2042_v11, 0.0 }
 0x5ef   : > { %v2092_v44 = vpack.c.bf16 %v2076_v15, %v2074_v32 }
 0x5f1   : > { %2481 = vmatmul.bf16.gmra.mxu3 %v2092_v44  ;;  %2383 = vmatmul.bf16.gmra.mxu1 %v2092_v44 }
 0x5f2   : > { %v1993_v7 = vpop.f32.mrf.mxu2 }
 0x5f3   : > { %v2075_v27 = vmax.f32 %v1993_v7, 0.0 }
 0x5f5   : > { %v2091_v55 = vpack.c.bf16 %v2075_v27, %v2073_v16 }
 0x5f7   : > { %2432 = vmatmul.bf16.gmra.mxu2 %v2091_v55  ;;  %2334 = vmatmul.bf16.gmra.mxu0 %v2091_v55 }
 0x5fe   : > { %v2349_v13 = vpop.f32.mrf.mxu1 }
 0x604   : > { %v2300_v41 = vpop.f32.mrf.mxu0  ;;  %v2447_v5 = vpop.f32.mrf.mxu3 }
 0x605   : > { %v2301_v26 = vadd.f32 %v2300_v41, %v4298_v8 }
 0x606   : > { %v2351_v23 = vpop.f32.mrf.mxu1 }
 0x607   : > { %v2350_v36 = vadd.f32 %v2349_v13, %v2301_v26 }
 0x60a   : > { %v2398_v19 = vpop.f32.mrf.mxu2 }
 0x60b   : > { %v2399_v2 = vadd.f32 %v2398_v19, %v4300_v62 }
 0x60c   : > { %v2302_v35 = vpop.f32.mrf.mxu0  ;;  %v2449_v46 = vpop.f32.mrf.mxu3 }
 0x60d   : > { %v2448_v51 = vadd.f32 %v2447_v5, %v2399_v2  ;;  %v2303_v43 = vadd.f32 %v2302_v35, %v4298_v8 }
 0x60e   : > { %v2354_v10 = vpop.f32.mrf.mxu1 }
 0x60f   : > { %v2487_v22 = vpack.c.bf16 %v2448_v51, %v2350_v36  ;;  %v2352_v61 = vadd.f32 %v2351_v23, %v2303_v43 }
 0x611   : > { %2503 = vst [vmem:[%s4305_s28] sm:$0xff] %v2487_v22 }
 0x612   : > { %v2400_v17 = vpop.f32.mrf.mxu2 }
 0x613   : > { %v2401_v6 = vadd.f32 %v2400_v17, %v4300_v62 }
 0x614   : > { %v2305_v3 = vpop.f32.mrf.mxu0  ;;  %v2452_v20 = vpop.f32.mrf.mxu3 }
 0x615   : > { %v2450_v24 = vadd.f32 %v2449_v46, %v2401_v6  ;;  %v2306_v48 = vadd.f32 %v2305_v3, %v4298_v8 }
 0x616   : > { %v2356_v9 = vpop.f32.mrf.mxu1 }
 0x617   : > { %v2488_v58 = vpack.c.bf16 %v2450_v24, %v2352_v61  ;;  %v2355_v38 = vadd.f32 %v2354_v10, %v2306_v48 }
 0x619   : > { %2504 = vst [vmem:[%s4305_s28 + $0x8] sm:$0xff] %v2488_v58 }
 0x61a   : > { %v2403_v37 = vpop.f32.mrf.mxu2 }
 0x61b   : > { %v2404_v45 = vadd.f32 %v2403_v37, %v4300_v62 }
 0x61c   : > { %v2307_v4 = vpop.f32.mrf.mxu0  ;;  %v2454_v21 = vpop.f32.mrf.mxu3 }
 0x61d   : > { %v2453_v59 = vadd.f32 %v2452_v20, %v2404_v45  ;;  %v2308_v25 = vadd.f32 %v2307_v4, %v4298_v8 }
 0x61e   : > { %v2359_v63 = vpop.f32.mrf.mxu1 }
 0x61f   : > { %v2489_v31 = vpack.c.bf16 %v2453_v59, %v2355_v38  ;;  %v2357_v54 = vadd.f32 %v2356_v9, %v2308_v25 }
 0x621   : > { %2505 = vst [vmem:[%s4305_s28 + $0x10] sm:$0xff] %v2489_v31 }
 0x622   : > { %v2405_v30 = vpop.f32.mrf.mxu2 }
 0x623   : > { %v2406_v29 = vadd.f32 %v2405_v30, %v4300_v62 }
 0x624   : > { %v2310_v42 = vpop.f32.mrf.mxu0  ;;  %v2457_v0 = vpop.f32.mrf.mxu3 }
 0x625   : > { %v2455_v47 = vadd.f32 %v2454_v21, %v2406_v29  ;;  %v2311_v12 = vadd.f32 %v2310_v42, %v4298_v8 }
 0x626   : > { %v2361_v28 = vpop.f32.mrf.mxu1 }
 0x627   : > { %v2490_v50 = vpack.c.bf16 %v2455_v47, %v2357_v54  ;;  %v2360_v53 = vadd.f32 %v2359_v63, %v2311_v12 }
 0x629   : > { %2506 = vst [vmem:[%s4305_s28 + $0x18] sm:$0xff] %v2490_v50 }
 0x62a   : > { %v2408_v1 = vpop.f32.mrf.mxu2 }
 0x62b   : > { %v2409_v52 = vadd.f32 %v2408_v1, %v4300_v62 }
 0x62c   : > { %v2312_v49 = vpop.f32.mrf.mxu0  ;;  %v2459_v14 = vpop.f32.mrf.mxu3 }
 0x62d   : > { %v2458_v33 = vadd.f32 %v2457_v0, %v2409_v52  ;;  %v2313_v39 = vadd.f32 %v2312_v49, %v4298_v8 }
 0x62e   : > { %v2364_v18 = vpop.f32.mrf.mxu1 }
 0x62f   : > { %v2491_v60 = vpack.c.bf16 %v2458_v33, %v2360_v53  ;;  %v2362_v11 = vadd.f32 %v2361_v28, %v2313_v39 }
 0x631   : > { %2507 = vst [vmem:[%s4305_s28 + $0x20] sm:$0xff] %v2491_v60 }
 0x632   : > { %v2410_v34 = vpop.f32.mrf.mxu2 }
 0x633   : > { %v2411_v57 = vadd.f32 %v2410_v34, %v4300_v62 }
 0x634   : > { %v2315_v40 = vpop.f32.mrf.mxu0  ;;  %v2462_v32 = vpop.f32.mrf.mxu3 }
 0x635   : > { %v2460_v15 = vadd.f32 %v2459_v14, %v2411_v57  ;;  %v2316_v16 = vadd.f32 %v2315_v40, %v4298_v8 }
 0x636   : > { %v2366_v44 = vpop.f32.mrf.mxu1 }
 0x637   : > { %v2492_v7 = vpack.c.bf16 %v2460_v15, %v2362_v11  ;;  %v2365_v41 = vadd.f32 %v2364_v18, %v2316_v16 }
 0x639   : > { %2508 = vst [vmem:[%s4305_s28 + $0x28] sm:$0xff] %v2492_v7 }
 0x63a   : > { %v2413_v27 = vpop.f32.mrf.mxu2 }
 0x63b   : > { %v2414_v55 = vadd.f32 %v2413_v27, %v4300_v62 }
 0x63c   : > { %v2317_v13 = vpop.f32.mrf.mxu0  ;;  %v2464_v56 = vpop.f32.mrf.mxu3 }
 0x63d   : > { %v2463_v5 = vadd.f32 %v2462_v32, %v2414_v55  ;;  %v2318_v19 = vadd.f32 %v2317_v13, %v4298_v8 }
 0x63e   : > { %v2369_v23 = vpop.f32.mrf.mxu1 }
 0x63f   : > { %v2493_v26 = vpack.c.bf16 %v2463_v5, %v2365_v41  ;;  %v2367_v51 = vadd.f32 %v2366_v44, %v2318_v19 }
 0x641   : > { %2509 = vst [vmem:[%s4305_s28 + $0x30] sm:$0xff] %v2493_v26 }
 0x642   : > { %v2415_v2 = vpop.f32.mrf.mxu2 }
 0x643   : > { %v2416_v35 = vadd.f32 %v2415_v2, %v4300_v62 }
 0x644   : > { %v2320_v46 = vpop.f32.mrf.mxu0  ;;  %v2467_v36 = vpop.f32.mrf.mxu3 }
 0x645   : > { %v2465_v10 = vadd.f32 %v2464_v56, %v2416_v35  ;;  %v2321_v17 = vadd.f32 %v2320_v46, %v4298_v8 }
 0x646   : > { %v2371_v43 = vpop.f32.mrf.mxu1 }
 0x647   : > { %v2494_v22 = vpack.c.bf16 %v2465_v10, %v2367_v51  ;;  %v2370_v24 = vadd.f32 %v2369_v23, %v2321_v17 }
 0x649   : > { %2510 = vst [vmem:[%s4305_s28 + $0x38] sm:$0xff] %v2494_v22 }
 0x64a   : > { %v2418_v6 = vpop.f32.mrf.mxu2 }
 0x64b   : > { %v2419_v3 = vadd.f32 %v2418_v6, %v4300_v62 }
 0x64c   : > { %v2322_v20 = vpop.f32.mrf.mxu0  ;;  %v2469_v61 = vpop.f32.mrf.mxu3 }
 0x64d   : > { %v2468_v9 = vadd.f32 %v2467_v36, %v2419_v3  ;;  %v2323_v48 = vadd.f32 %v2322_v20, %v4298_v8 }
 0x64e   : > { %v2374_v37 = vpop.f32.mrf.mxu1 }
 0x64f   : > { %v2495_v58 = vpack.c.bf16 %v2468_v9, %v2370_v24  ;;  %v2372_v59 = vadd.f32 %v2371_v43, %v2323_v48 }
 0x651   : > { %2511 = vst [vmem:[%s4305_s28 + $0x40] sm:$0xff] %v2495_v58 }
 0x652   : > { %v2420_v45 = vpop.f32.mrf.mxu2 }
 0x653   : > { %v2421_v4 = vadd.f32 %v2420_v45, %v4300_v62 }
 0x654   : > { %v2325_v21 = vpop.f32.mrf.mxu0  ;;  %v2472_v38 = vpop.f32.mrf.mxu3 }
 0x655   : > { %v2470_v63 = vadd.f32 %v2469_v61, %v2421_v4  ;;  %v2326_v25 = vadd.f32 %v2325_v21, %v4298_v8 }
 0x656   : > { %v2376_v42 = vpop.f32.mrf.mxu1 }
 0x657   : > { %v2496_v31 = vpack.c.bf16 %v2470_v63, %v2372_v59  ;;  %v2375_v47 = vadd.f32 %v2374_v37, %v2326_v25 }
 0x659   : > { %2512 = vst [vmem:[%s4305_s28 + $0x48] sm:$0xff] %v2496_v31 }
 0x65a   : > { %v2423_v30 = vpop.f32.mrf.mxu2 }
 0x65b   : > { %v2424_v29 = vadd.f32 %v2423_v30, %v4300_v62 }
 0x65c   : > { %v2327_v0 = vpop.f32.mrf.mxu0  ;;  %v2474_v54 = vpop.f32.mrf.mxu3 }
 0x65d   : > { %v2473_v28 = vadd.f32 %v2472_v38, %v2424_v29  ;;  %v2328_v12 = vadd.f32 %v2327_v0, %v4298_v8 }
 0x65e   : > { %v2379_v33 = vpop.f32.mrf.mxu1 }
 0x65f   : > { %v2497_v50 = vpack.c.bf16 %v2473_v28, %v2375_v47  ;;  %v2377_v14 = vadd.f32 %v2376_v42, %v2328_v12 }
 0x661   : > { %2513 = vst [vmem:[%s4305_s28 + $0x50] sm:$0xff] %v2497_v50 }
 0x662   : > { %v2425_v1 = vpop.f32.mrf.mxu2 }
 0x663   : > { %v2426_v52 = vadd.f32 %v2425_v1, %v4300_v62 }
 0x664   : > { %v2330_v49 = vpop.f32.mrf.mxu0  ;;  %v2477_v18 = vpop.f32.mrf.mxu3 }
 0x665   : > { %v2475_v53 = vadd.f32 %v2474_v54, %v2426_v52  ;;  %v2331_v39 = vadd.f32 %v2330_v49, %v4298_v8 }
 0x666   : > { %v2381_v44 = vpop.f32.mrf.mxu1 }
 0x667   : > { %v2498_v60 = vpack.c.bf16 %v2475_v53, %v2377_v14  ;;  %v2380_v32 = vadd.f32 %v2379_v33, %v2331_v39 }
 0x669   : > { %2514 = vst [vmem:[%s4305_s28 + $0x58] sm:$0xff] %v2498_v60 }
 0x66a   : > { %v2428_v34 = vpop.f32.mrf.mxu2 }
 0x66b   : > { %v2429_v57 = vadd.f32 %v2428_v34, %v4300_v62 }
 0x66c   : > { %v2332_v40 = vpop.f32.mrf.mxu0  ;;  %v2479_v7 = vpop.f32.mrf.mxu3 }
 0x66d   : > { %v2478_v11 = vadd.f32 %v2477_v18, %v2429_v57  ;;  %v2333_v16 = vadd.f32 %v2332_v40, %v4298_v8 }
 0x66e   : > { %v2384_v26 = vpop.f32.mrf.mxu1 }
 0x66f   : > { %v2499_v15 = vpack.c.bf16 %v2478_v11, %v2380_v32  ;;  %v2382_v56 = vadd.f32 %v2381_v44, %v2333_v16 }
 0x671   : > { %2515 = vst [vmem:[%s4305_s28 + $0x60] sm:$0xff] %v2499_v15 }
 0x672   : > { %v2430_v27 = vpop.f32.mrf.mxu2 }
 0x673   : > { %v2431_v55 = vadd.f32 %v2430_v27, %v4300_v62 }
 0x674   : > { %v2335_v13 = vpop.f32.mrf.mxu0  ;;  %v2482_v2 = vpop.f32.mrf.mxu3 }
 0x675   : > { %v2480_v41 = vadd.f32 %v2479_v7, %v2431_v55  ;;  %v2336_v23 = vadd.f32 %v2335_v13, %v4298_v8 }
 0x676   : > { %v2386_v6 = vpop.f32.mrf.mxu1 }
 0x677   : > { %v2500_v5 = vpack.c.bf16 %v2480_v41, %v2382_v56  ;;  %v2385_v46 = vadd.f32 %v2384_v26, %v2336_v23 }
 0x679   : > { %2516 = vst [vmem:[%s4305_s28 + $0x68] sm:$0xff] %v2500_v5 }
 0x67a   : > { %v2433_v19 = vpop.f32.mrf.mxu2 }
 0x67b   : > { %v2434_v35 = vadd.f32 %v2433_v19, %v4300_v62 }
 0x67c   : > { %v2337_v51 = vpop.f32.mrf.mxu0  ;;  %v2484_v3 = vpop.f32.mrf.mxu3 }
 0x67d   : > { %v2483_v36 = vadd.f32 %v2482_v2, %v2434_v35  ;;  %v2338_v22 = vadd.f32 %v2337_v51, %v4298_v8 }
 0x67f   : > { %v2501_v10 = vpack.c.bf16 %v2483_v36, %v2385_v46  ;;  %v2387_v20 = vadd.f32 %v2386_v6, %v2338_v22 }
 0x681   : > { %2517 = vst [vmem:[%s4305_s28 + $0x70] sm:$0xff] %v2501_v10 }
 0x682   : > { %v2435_v43 = vpop.f32.mrf.mxu2 }
 0x683   : > { %v2436_v17 = vadd.f32 %v2435_v43, %v4300_v62 }
 0x685   : > { %v2485_v61 = vadd.f32 %v2484_v3, %v2436_v17 }
 0x687   : > { %v2502_v24 = vpack.c.bf16 %v2485_v61, %v2387_v20 }
 0x689   : > { %2518 = vst [vmem:[%s4305_s28 + $0x78] sm:$0xff] %v2502_v24 }
 0x68a   : > { %3656 = shalt.err (!%p3653_p9)
}
 0x68b   : > { %s3721_s30 = smov 128   ;;  %s3722_s6 = smov 8  }
 0x68c   : > { %3363 = dma.vmem_to_hbm [thread:$0]  (%p3862_p3), %s2534_s23, 2048, %s2536_s11, %s2520_s17, %s3721_s30, %s3721_s30, %s3722_s6  }
 0x68d PF: > { %s2550_s18 = sand.u32 1, %s3699_s13   ;;  %p4471_p12 = scmp.ge.s32.totalorder %s3711_s16, 2 }
 0x68e   : > { %s2551_s22 = scalar_lea.sflag [#allocation4], %s2550_s18 }
 0x68f   : > { %p3386_p13 = pnand %p4471_p12, %p3813_p6 }
 0x691   : > { %p3387_p0 = pneg %p3386_p13 }
 0x693   : > { %3694 = dma.done.wait (%p3387_p0), %s2551_s22, 2048  }
 0x694   : > { %3696 = vsyncadd (%p3387_p0), %s2551_s22, 4294965248  ;;  %s4472_s16 = sld [smem:[#allocation22_spill]]  ;;  %s4475_s13 = smov %s3703_s14 }
 0x695   : > { %s4473_s25 = sld [smem:[#allocation20_spill]] }
 0x696   : > { %s4474_s15 = sld [smem:[#allocation23_spill]] }
 0x69a   : > { %p28_p5 = scmp.ge.s32.totalorder %s4472_s16, 4  }
 0x69b   : > { %s4476_s14 = smov %s4473_s25 }
 0x69c   :  { %30 = sbr.rel (!%p28_p5) target bundleno = 15 (0xf), region = 134 }
 0x6a1   :  { %2557 = vsyncpa [#allocation3], 1 }
 0x6a2   :  { %2559 = vsyncpa [#allocation3 + $0x1], 1 }
 0x6a3   :  { %2560 = vsyncpa [#allocation6], 1 }
 0x6a4   :  { %2562 = vsyncpa [#allocation6 + $0x1], 1 }
 0x6a5   :  { %2563 = vsyncpa [#allocation9], 1 }
 0x6a6   :  { %2564 = vsyncpa [#allocation12], 1 }
 0x6a7   :  { %2565 = vsyncpa [#allocation4], 1 }
 0x6a8   :  { %2567 = vsyncpa [#allocation4 + $0x1], 1 }

</bundles_post_ra>
